<compile_context>
chip_gen: v6e
topology: v6e:2x2x1
jax: 0.10.0
libtpu: 0.0.40
codegen_flags: <defaults>
</compile_context>

<pallas_src>
import jax
import jax.numpy as jnp
from jax.experimental import pallas as pl
from jax.experimental.pallas import tpu as pltpu

IN_DIM = 32 * 32 * 3      # 3072
H_DIM = 256
OUT_DIM = 10
OUT_PAD = 128             # lane-dense padded output width
NEG_INF = -1e30           # finite "minus infinity" for padded logit lanes


def dense_nn_kernel(x_ref, w1_ref, b1_ref, w2_ref, b2_ref, w3_ref, b3_ref, o_ref):
    # x_ref: (TB, 3072) f32 -- cast to bf16 here (one VPU pass, hidden under
    # the MXU) instead of a standalone XLA cast pass in the wrapper.
    # w1: (3072, 256) bf16   w2: (256, 256) bf16   w3: (256, 128) bf16 (cols >= 10 zero)
    # b1/b2: (1, 256) f32    b3: (1, 128) f32 with b3[:, 10:] = NEG_INF
    x = x_ref[...].astype(jnp.bfloat16)

    h1 = jnp.dot(x, w1_ref[...], preferred_element_type=jnp.float32) + b1_ref[...]
    h1 = jnp.maximum(h1, 0.0)

    h2 = jnp.dot(h1.astype(jnp.bfloat16), w2_ref[...],
                 preferred_element_type=jnp.float32) + b2_ref[...]
    h2 = jnp.maximum(h2, 0.0)

    logits = jnp.dot(h2.astype(jnp.bfloat16), w3_ref[...],
                     preferred_element_type=jnp.float32) + b3_ref[...]

    # Softmax over the 128 padded lanes == softmax over the real 10 logits,
    # because the padded lanes carry a NEG_INF bias (exp underflows to 0).
    # Invariant: real logits must stay far above -1e30 (true for any sane
    # weight scale).
    m = jnp.max(logits, axis=-1, keepdims=True)
    e = jnp.exp(logits - m)
    denom = jnp.sum(e, axis=-1, keepdims=True)
    o_ref[...] = (e * pl.reciprocal(denom, approx=True)).astype(o_ref.dtype)


def _round_up(n, m):
    return ((n + m - 1) // m) * m


def _choose_tb(batch):
    # bf16 packs 16 sublanes per vreg -> keep TB 16-aligned (8 for tiny batch).
    if batch <= 8:
        return 8
    if batch < 64:
        return _round_up(batch, 16)
    # >= 64 rows: always split into >= 2 grid steps so both v7x TensorCores
    # get work; cap the tile at 512 rows (amortizes the ~0.35 us per-step
    # overhead; ~20 MiB VMEM with the f32 x tile double-buffered).
    return min(512, _round_up(pl.cdiv(batch, 2), 16))


def prepare_params(params):
    """One-time weight prep, hoisted out of the per-call forward path."""
    w1, b1, w2, b2, w3, b3 = params
    w1_bf = w1.astype(jnp.bfloat16)
    w2_bf = w2.astype(jnp.bfloat16)
    # Lane-dense last layer: pad 10 -> 128 columns (zero weights, NEG_INF bias).
    w3_pad = jnp.zeros((H_DIM, OUT_PAD), jnp.bfloat16).at[:, :OUT_DIM].set(
        w3.astype(jnp.bfloat16))
    b3_pad = jnp.full((1, OUT_PAD), NEG_INF, jnp.float32).at[:, :OUT_DIM].set(
        b3.reshape(1, OUT_DIM).astype(jnp.float32))
    b1 = b1.reshape(1, H_DIM).astype(jnp.float32)
    b2 = b2.reshape(1, H_DIM).astype(jnp.float32)
    return (w1_bf, b1, w2_bf, b2, w3_pad, b3_pad)


def dense_nn_forward(x_nchw, prepared):
    w1_bf, b1, w2_bf, b2, w3_pad, b3_pad = prepared
    B = x_nchw.shape[0]
    # Row-major flatten of NCHW == torch.flatten(x, 1). x stays f32; the bf16
    # cast happens inside the kernel (no extra standalone HBM pass).
    x_flat = x_nchw.reshape(B, -1)

    TB = _choose_tb(B)
    grid = (pl.cdiv(B, TB),)   # ragged last block handled by Pallas; no jnp.pad

    weight_bytes = ((IN_DIM * H_DIM + H_DIM * H_DIM + H_DIM * OUT_PAD) * 2
                    + (2 * H_DIM + OUT_PAD) * 4)
    cost = pl.CostEstimate(
        flops=2 * B * (IN_DIM * H_DIM + H_DIM * H_DIM + H_DIM * OUT_PAD),
        transcendentals=B * OUT_PAD,
        bytes_accessed=B * IN_DIM * 4 + weight_bytes + B * OUT_PAD * 4,
    )

    out = pl.pallas_call(
        dense_nn_kernel,
        out_shape=jax.ShapeDtypeStruct((B, OUT_PAD), jnp.float32),
        grid_spec=pltpu.PrefetchScalarGridSpec(
            num_scalar_prefetch=0,
            grid=grid,
            in_specs=[
                pl.BlockSpec((TB, IN_DIM), lambda i: (i, 0)),
                pl.BlockSpec((IN_DIM, H_DIM), lambda i: (0, 0)),
                pl.BlockSpec((1, H_DIM), lambda i: (0, 0)),
                pl.BlockSpec((H_DIM, H_DIM), lambda i: (0, 0)),
                pl.BlockSpec((1, H_DIM), lambda i: (0, 0)),
                pl.BlockSpec((H_DIM, OUT_PAD), lambda i: (0, 0)),
                pl.BlockSpec((1, OUT_PAD), lambda i: (0, 0)),
            ],
            out_specs=pl.BlockSpec((TB, OUT_PAD), lambda i: (i, 0)),
        ),
        compiler_params=pltpu.CompilerParams(
            dimension_semantics=("parallel",),
            # TB=512 with the f32 x tile double-buffered needs ~20 MiB; raise
            # the scoped limit so it fits on every generation (v5e default is
            # 16 MiB) while leaving headroom under v7x's 64 MiB physical VMEM.
            vmem_limit_bytes=40 * 1024 * 1024,
        ),
        cost_estimate=cost,
    )(x_flat, w1_bf, b1, w2_bf, b2, w3_pad, b3_pad)

    # Slice back to the 10 real classes (padded lanes are exactly 0).
    return out[:, :OUT_DIM]


def init_params(key):
    k1, k2, k3 = jax.random.split(key, 3)
    # deterministic synthetic init (scaled normal); biases stored as (1, N)
    w1 = jax.random.normal(k1, (IN_DIM, H_DIM), jnp.float32) * 0.02
    b1 = jnp.full((1, H_DIM), 0.01, jnp.float32)
    w2 = jax.random.normal(k2, (H_DIM, H_DIM), jnp.float32) * 0.05
    b2 = jnp.full((1, H_DIM), 0.01, jnp.float32)
    w3 = jax.random.normal(k3, (H_DIM, OUT_DIM), jnp.float32) * 0.05
    b3 = jnp.zeros((1, OUT_DIM), jnp.float32)
    return (w1, b1, w2, b2, w3, b3)


def reference_forward(x_nchw, params):
    # Pure f32 reference matching the PyTorch module semantics.
    w1, b1, w2, b2, w3, b3 = params
    x = x_nchw.reshape(x_nchw.shape[0], -1)
    h1 = jnp.maximum(x @ w1 + b1, 0.0)
    h2 = jnp.maximum(h1 @ w2 + b2, 0.0)
    logits = h2 @ w3 + b3
    return jax.nn.softmax(logits, axis=1)


def _check(out, ref, B):
    assert out.shape == (B, OUT_DIM)
    # bf16 weights/activations + approx reciprocal => loosened tolerances.
    assert jnp.allclose(out, ref, atol=2e-2, rtol=2e-2)
    assert jnp.allclose(jnp.sum(out, axis=1), 1.0, atol=1e-2)
    assert not jnp.any(jnp.isnan(out))


if __name__ == "__main__":
    key = jax.random.PRNGKey(0)
    kx1, kx2, kp = jax.random.split(key, 3)

    params = init_params(kp)
    prepared = jax.tree_util.tree_map(jax.block_until_ready, prepare_params(params))

    forward = jax.jit(dense_nn_forward)

    # Small batch (single grid step).
    B1 = 8
    x1 = jax.random.normal(kx1, (B1, 3, 32, 32), jnp.float32)  # NCHW like PyTorch
    out1 = jax.block_until_ready(forward(x1, prepared))
    _check(out1, reference_forward(x1, params), B1)

    # Mid batch exercising the >=2-step grid and the ragged last block
    # (B=100 -> TB=64, grid=(2,), last block has 36 valid rows).
    B2 = 100
    x2 = jax.random.normal(kx2, (B2, 3, 32, 32), jnp.float32)
    out2 = jax.block_until_ready(forward(x2, prepared))
    _check(out2, reference_forward(x2, params), B2)

    print("KERNEL_OK")
</pallas_src>

<mosaic_0001>
module attributes {stable_mosaic.version = 11 : i64} {
  func.func @dense_nn_kernel(%arg0: i32, %arg1: memref<8x3072xf32, #tpu.memory_space<vmem>>, %arg2: memref<3072x256xbf16, #tpu.memory_space<vmem>>, %arg3: memref<1x256xf32, #tpu.memory_space<vmem>>, %arg4: memref<256x256xbf16, #tpu.memory_space<vmem>>, %arg5: memref<1x256xf32, #tpu.memory_space<vmem>>, %arg6: memref<256x128xbf16, #tpu.memory_space<vmem>>, %arg7: memref<1x128xf32, #tpu.memory_space<vmem>>, %arg8: memref<8x128xf32, #tpu.memory_space<vmem>>) attributes {dimension_semantics = [#tpu.dimension_semantics<parallel>], iteration_bounds = array<i64: 1>, scalar_prefetch = 0 : i64, scratch_operands = 0 : i64, tpu.core_type = #tpu.core_type<tc>, window_params = [{transform_indices = @transform_0, window_bounds = array<i64: 8, 3072>}, {pipeline_mode = #tpu.pipeline_mode<synchronous>, transform_indices = @transform_1, window_bounds = array<i64: 3072, 256>}, {pipeline_mode = #tpu.pipeline_mode<synchronous>, transform_indices = @transform_2, window_bounds = array<i64: 1, 256>}, {pipeline_mode = #tpu.pipeline_mode<synchronous>, transform_indices = @transform_3, window_bounds = array<i64: 256, 256>}, {pipeline_mode = #tpu.pipeline_mode<synchronous>, transform_indices = @transform_4, window_bounds = array<i64: 1, 256>}, {pipeline_mode = #tpu.pipeline_mode<synchronous>, transform_indices = @transform_5, window_bounds = array<i64: 256, 128>}, {pipeline_mode = #tpu.pipeline_mode<synchronous>, transform_indices = @transform_6, window_bounds = array<i64: 1, 128>}, {transform_indices = @transform_7, window_bounds = array<i64: 8, 128>}]} {
    %c0 = arith.constant 0 : index
    %c0_0 = arith.constant 0 : index
    %0 = vector.load %arg1[%c0, %c0_0] : memref<8x3072xf32, #tpu.memory_space<vmem>>, vector<8x3072xf32>
    %1 = arith.truncf %0 : vector<8x3072xf32> to vector<8x3072xbf16>
    %c0_1 = arith.constant 0 : index
    %c0_2 = arith.constant 0 : index
    %2 = vector.load %arg2[%c0_1, %c0_2] : memref<3072x256xbf16, #tpu.memory_space<vmem>>, vector<3072x256xbf16>
    %cst = arith.constant dense<0.000000e+00> : vector<8x256xf32>
    %3 = tpu.matmul %1, %2, %cst {dimension_numbers = #tpu.dot_dimension_numbers<[1], [0], [0], [1], [0, 0, 1, 1], [], []>} : vector<8x3072xbf16>, vector<3072x256xbf16>, vector<8x256xf32> -> vector<8x256xf32>
    %c0_3 = arith.constant 0 : index
    %c0_4 = arith.constant 0 : index
    %4 = vector.load %arg3[%c0_3, %c0_4] : memref<1x256xf32, #tpu.memory_space<vmem>>, vector<1x256xf32>
    %5 = vector.broadcast %4 : vector<1x256xf32> to vector<8x256xf32>
    %6 = arith.addf %3, %5 : vector<8x256xf32>
    %cst_5 = arith.constant 0.000000e+00 : f32
    %7 = vector.broadcast %cst_5 : f32 to vector<8x256xf32>
    %8 = arith.maximumf %6, %7 : vector<8x256xf32>
    %9 = arith.truncf %8 : vector<8x256xf32> to vector<8x256xbf16>
    %c0_6 = arith.constant 0 : index
    %c0_7 = arith.constant 0 : index
    %10 = vector.load %arg4[%c0_6, %c0_7] : memref<256x256xbf16, #tpu.memory_space<vmem>>, vector<256x256xbf16>
    %cst_8 = arith.constant dense<0.000000e+00> : vector<8x256xf32>
    %11 = tpu.matmul %9, %10, %cst_8 {dimension_numbers = #tpu.dot_dimension_numbers<[1], [0], [0], [1], [0, 0, 1, 1], [], []>} : vector<8x256xbf16>, vector<256x256xbf16>, vector<8x256xf32> -> vector<8x256xf32>
    %c0_9 = arith.constant 0 : index
    %c0_10 = arith.constant 0 : index
    %12 = vector.load %arg5[%c0_9, %c0_10] : memref<1x256xf32, #tpu.memory_space<vmem>>, vector<1x256xf32>
    %13 = vector.broadcast %12 : vector<1x256xf32> to vector<8x256xf32>
    %14 = arith.addf %11, %13 : vector<8x256xf32>
    %cst_11 = arith.constant 0.000000e+00 : f32
    %15 = vector.broadcast %cst_11 : f32 to vector<8x256xf32>
    %16 = arith.maximumf %14, %15 : vector<8x256xf32>
    %17 = arith.truncf %16 : vector<8x256xf32> to vector<8x256xbf16>
    %c0_12 = arith.constant 0 : index
    %c0_13 = arith.constant 0 : index
    %18 = vector.load %arg6[%c0_12, %c0_13] : memref<256x128xbf16, #tpu.memory_space<vmem>>, vector<256x128xbf16>
    %cst_14 = arith.constant dense<0.000000e+00> : vector<8x128xf32>
    %19 = tpu.matmul %17, %18, %cst_14 {dimension_numbers = #tpu.dot_dimension_numbers<[1], [0], [0], [1], [0, 0, 1, 1], [], []>} : vector<8x256xbf16>, vector<256x128xbf16>, vector<8x128xf32> -> vector<8x128xf32>
    %c0_15 = arith.constant 0 : index
    %c0_16 = arith.constant 0 : index
    %20 = vector.load %arg7[%c0_15, %c0_16] : memref<1x128xf32, #tpu.memory_space<vmem>>, vector<1x128xf32>
    %21 = vector.broadcast %20 : vector<1x128xf32> to vector<8x128xf32>
    %22 = arith.addf %19, %21 : vector<8x128xf32>
    %cst_17 = arith.constant dense<0xFF800000> : vector<8xf32>
    %23 = vector.multi_reduction <maximumf>, %22, %cst_17 [1] : vector<8x128xf32> to vector<8xf32>
    %24 = vector.shape_cast %23 : vector<8xf32> to vector<8x1xf32>
    %25 = vector.broadcast %24 : vector<8x1xf32> to vector<8x128xf32>
    %26 = arith.subf %22, %25 : vector<8x128xf32>
    %27 = math.exp %26 : vector<8x128xf32>
    %cst_18 = arith.constant dense<0.000000e+00> : vector<8xf32>
    %28 = vector.multi_reduction <add>, %27, %cst_18 [1] : vector<8x128xf32> to vector<8xf32>
    %29 = vector.shape_cast %28 : vector<8xf32> to vector<8x1xf32>
    %30 = tpu.reciprocal %29 {approx = true} : vector<8x1xf32> -> vector<8x1xf32>
    %31 = vector.broadcast %30 : vector<8x1xf32> to vector<8x128xf32>
    %32 = arith.mulf %27, %31 : vector<8x128xf32>
    %c0_19 = arith.constant 0 : index
    %c0_20 = arith.constant 0 : index
    %33 = vector.load %arg8[%c0_19, %c0_20] : memref<8x128xf32, #tpu.memory_space<vmem>>, vector<8x128xf32>
    tpu.vector_store %arg8[%c0_19, %c0_20], %32 {strides = array<i32>} : memref<8x128xf32, #tpu.memory_space<vmem>>, vector<8x128xf32>,
    return
  }
  func.func @transform_0(%arg0: i32) -> (i32, i32) {
    %c0_i32 = arith.constant 0 : i32
    %c0_i32_0 = arith.constant 0 : i32
    return %arg0, %c0_i32 : i32, i32
  }
  func.func @transform_1(%arg0: i32) -> (i32, i32) {
    %c0_i32 = arith.constant 0 : i32
    %c0_i32_0 = arith.constant 0 : i32
    %c0_i32_1 = arith.constant 0 : i32
    return %c0_i32, %c0_i32_0 : i32, i32
  }
  func.func @transform_2(%arg0: i32) -> (i32, i32) {
    %c0_i32 = arith.constant 0 : i32
    %c0_i32_0 = arith.constant 0 : i32
    %c0_i32_1 = arith.constant 0 : i32
    return %c0_i32, %c0_i32_0 : i32, i32
  }
  func.func @transform_3(%arg0: i32) -> (i32, i32) {
    %c0_i32 = arith.constant 0 : i32
    %c0_i32_0 = arith.constant 0 : i32
    %c0_i32_1 = arith.constant 0 : i32
    return %c0_i32, %c0_i32_0 : i32, i32
  }
  func.func @transform_4(%arg0: i32) -> (i32, i32) {
    %c0_i32 = arith.constant 0 : i32
    %c0_i32_0 = arith.constant 0 : i32
    %c0_i32_1 = arith.constant 0 : i32
    return %c0_i32, %c0_i32_0 : i32, i32
  }
  func.func @transform_5(%arg0: i32) -> (i32, i32) {
    %c0_i32 = arith.constant 0 : i32
    %c0_i32_0 = arith.constant 0 : i32
    %c0_i32_1 = arith.constant 0 : i32
    return %c0_i32, %c0_i32_0 : i32, i32
  }
  func.func @transform_6(%arg0: i32) -> (i32, i32) {
    %c0_i32 = arith.constant 0 : i32
    %c0_i32_0 = arith.constant 0 : i32
    %c0_i32_1 = arith.constant 0 : i32
    return %c0_i32, %c0_i32_0 : i32, i32
  }
  func.func @transform_7(%arg0: i32) -> (i32, i32) {
    %c0_i32 = arith.constant 0 : i32
    %c0_i32_0 = arith.constant 0 : i32
    return %arg0, %c0_i32 : i32, i32
  }
}

</mosaic_0001>

<bundles_post_ra>
// kernel: dense_nn_forward.1
= control target key start
LH: loop header
LB: loop body
LE: loop exit
PB: predicated region body
PF: predicated region fallthrough
CT: control target
= control target key end

     0   :  { %12 = vsyncpa [#allocation3], 0  ;;  %s4850_s0 = inlined_call_operand.vmem [shape: f32[8,3072], index: 0, kind: input, shape index: {}]   ;;  %s4851_s1 = inlined_call_operand.hbm [shape: bf16[3072,256], index: 1, kind: input, shape index: {}]   ;;  %s4852_s2 = inlined_call_operand.hbm [shape: f32[1,256], index: 2, kind: input, shape index: {}]   ;;  %s4853_s3 = inlined_call_operand.hbm [shape: bf16[256,256], index: 3, kind: input, shape index: {}]   ;;  %s4854_s4 = inlined_call_operand.hbm [shape: f32[1,256], index: 4, kind: input, shape index: {}]   ;;  %s4855_s5 = inlined_call_operand.hbm [shape: bf16[256,128], index: 5, kind: input, shape index: {}]   ;;  %s4856_s6 = inlined_call_operand.hbm [shape: f32[1,128], index: 6, kind: input, shape index: {}]   ;;  %s4857_s7 = inlined_call_operand.hbm [shape: f32[8,128], index: 7, kind: output, shape index: {}]  }
   0x1   :  { %13 = vsyncpa [#allocation6], 0 }
   0x2   :  { %14 = vsyncpa [#allocation9], 0 }
   0x3   :  { %15 = vsyncpa [#allocation12], 0 }
   0x4   :  { %16 = vsyncpa [#allocation4], 0  ;;  %s4676_s24 = smov [#allocation5]   ;;  %s4677_s26 = smov [#allocation8]  }
   0x5   :  { %s37_s25 = sshll.u32 %s4676_s24, 4  ;;  %s59_s27 = sshll.u32 %s4677_s26, 4  ;;  %s38_s25 = int_to_ptr.vmem [resolvable:$true] %s37_s25  ;;  %s60_s27 = int_to_ptr.vmem [resolvable:$true] %s59_s27 }
   0x6   :  { %s4534_s28 = scalar_lea.vmem %s38_s25, 32  ;;  %p4539_p1 = scmp.lt.s32.totalorder %s38_s25, %s38_s25 }
   0x7   :  { %p4535_p0 = scmp.ne.s32.totalorder %s38_s25, %s4534_s28  ;;  %p4540_p2 = scmp.lt.s32.totalorder %s4534_s28, %s4534_s28 }
   0x9   :  { %p4541_p3 = por %p4540_p2, %p4539_p1 }
   0xb   :  { %p4542_p4 = pnand %p4541_p3, %p4535_p0 }
   0xd   :  { %4545 = shalt.err (!%p4542_p4)
}
   0xe   :  { %40 = dma.hbm_to_vmem [thread:$0]  %s4852_s2, 32, %s38_s25, [#allocation6]  }
   0xf   :  { %s4554_s8 = scalar_lea.vmem %s60_s27, 32  ;;  %p4559_p6 = scmp.lt.s32.totalorder %s60_s27, %s60_s27 }
  0x10   :  { %p4555_p5 = scmp.ne.s32.totalorder %s60_s27, %s4554_s8  ;;  %p4560_p7 = scmp.lt.s32.totalorder %s4554_s8, %s4554_s8 }
  0x12   :  { %p4561_p8 = por %p4560_p7, %p4559_p6 }
  0x14   :  { %p4562_p9 = pnand %p4561_p8, %p4555_p5 }
  0x16   :  { %4565 = shalt.err (!%p4562_p9)
}
  0x17   :  { %62 = dma.hbm_to_vmem [thread:$0]  %s4854_s4, 32, %s60_s27, [#allocation9]  }
  0x18   :  { %s4678_s11 = smov [#allocation2]  }
  0x19   :  { %s24_s12 = sshll.u32 %s4678_s11, 4  ;;  %s25_s12 = int_to_ptr.vmem [resolvable:$true] %s24_s12 }
  0x1a   :  { %s4574_s13 = scalar_lea.vmem %s25_s12, 49152  ;;  %p4579_p11 = scmp.lt.s32.totalorder %s25_s12, %s25_s12 }
  0x1b   :  { %p4575_p10 = scmp.ne.s32.totalorder %s25_s12, %s4574_s13  ;;  %p4580_p12 = scmp.lt.s32.totalorder %s4574_s13, %s4574_s13 }
  0x1d   :  { %p4581_p13 = por %p4580_p12, %p4579_p11 }
  0x1f   :  { %p4582_p0 = pnand %p4581_p13, %p4575_p10 }
  0x21   :  { %4585 = shalt.err (!%p4582_p0)
}
  0x22   :  { %s4679_s2 = smov 128   ;;  %s4680_s14 = smov 8  }
  0x23   :  { %30 = dma.hbm_to_vmem [thread:$0]  %s4851_s1, 49152, %s25_s12, [#allocation3], %s4679_s2, %s4679_s2, %s4680_s14  }
  0x24   :  { %s4681_s17 = smov [#allocation7]   ;;  %s4682_s4 = smov [#allocation10]  }
  0x25   :  { %s46_s18 = sshll.u32 %s4681_s17, 4  ;;  %s68_s19 = sshll.u32 %s4682_s4, 4  ;;  %s47_s18 = int_to_ptr.vmem [resolvable:$true] %s46_s18  ;;  %s69_s19 = int_to_ptr.vmem [resolvable:$true] %s68_s19 }
  0x26   :  { %s4594_s20 = scalar_lea.vmem %s47_s18, 4096  ;;  %p4599_p2 = scmp.lt.s32.totalorder %s47_s18, %s47_s18 }
  0x27   :  { %p4595_p1 = scmp.ne.s32.totalorder %s47_s18, %s4594_s20  ;;  %p4600_p3 = scmp.lt.s32.totalorder %s4594_s20, %s4594_s20 }
  0x29   :  { %p4601_p4 = por %p4600_p3, %p4599_p2 }
  0x2b   :  { %p4602_p5 = pnand %p4601_p4, %p4595_p1 }
  0x2d   :  { %4605 = shalt.err (!%p4602_p5)
}
  0x2e   :  { %52 = dma.hbm_to_vmem [thread:$0]  %s4853_s3, 4096, %s47_s18, [#allocation6], %s4679_s2, %s4679_s2, %s4680_s14  }
  0x2f   :  { %s4614_s23 = scalar_lea.vmem %s69_s19, 2048  ;;  %p4619_p7 = scmp.lt.s32.totalorder %s69_s19, %s69_s19 }
  0x30   :  { %p4615_p6 = scmp.ne.s32.totalorder %s69_s19, %s4614_s23  ;;  %p4620_p8 = scmp.lt.s32.totalorder %s4614_s23, %s4614_s23 }
  0x32   :  { %p4621_p9 = por %p4620_p8, %p4619_p7 }
  0x34   :  { %p4622_p10 = pnand %p4621_p9, %p4615_p6 }
  0x36   :  { %4625 = shalt.err (!%p4622_p10)
}
  0x37   :  { %s4683_s1 = smov 64   ;;  %s4684_s24 = smov 4  }
  0x38   :  { %74 = dma.hbm_to_vmem [thread:$0]  %s4855_s5, 2048, %s69_s19, [#allocation9], %s4683_s1, %s4683_s1, %s4684_s24  }
  0x39   :  { %s4685_s27 = smov [#allocation11]  }
  0x3a   :  { %s81_s28 = sshll.u32 %s4685_s27, 4  ;;  %s82_s28 = int_to_ptr.vmem [resolvable:$true] %s81_s28 }
  0x3b   :  { %s4634_s29 = scalar_lea.vmem %s82_s28, 16  ;;  %s4638_s3 = scalar_lea.vmem %s82_s28, 32 }
  0x3c   :  { %p4635_p11 = scmp.ne.s32.totalorder %s82_s28, %s4634_s29  ;;  %p4639_p12 = scmp.lt.s32.totalorder %s82_s28, %s82_s28 }
  0x3d   :  { %p4640_p13 = scmp.lt.s32.totalorder %s4638_s3, %s4634_s29 }
  0x3f   :  { %p4641_p0 = por %p4640_p13, %p4639_p12 }
  0x41   :  { %p4642_p1 = pnand %p4641_p0, %p4635_p11 }
  0x43   :  { %4645 = shalt.err (!%p4642_p1)
}
  0x44   :  { %84 = dma.hbm_to_vmem [thread:$0]  %s4856_s6, 16, %s82_s28, [#allocation12]  }
  0x45   :  { %4666 = dma.done.wait [#allocation3], 49152  }
  0x46   :  { %4667 = vsyncadd [#allocation3], 4294918144 }
  0x47   :  { %4668 = dma.done.wait [#allocation6], 4128  }
  0x48   :  { %4669 = vsyncadd [#allocation6], 4294963168 }
  0x49   :  { %4670 = dma.done.wait [#allocation9], 2080  }
  0x4a   :  { %4671 = vsyncadd [#allocation9], 4294965216 }
  0x4b   :  { %4672 = dma.done.wait [#allocation12], 16  }
  0x4c   :  { %4673 = vsyncadd [#allocation12], 4294967280  ;;  %v3882_v0 = vld [vmem:[#allocation2 + $0x74] ss:$8 sps:$4 sm:$0xff]   ;;  %v3886_v2 = vld [vmem:[#allocation2 + $0x70] ss:$8 sps:$4 sm:$0xff]  }
  0x4d   :  { %v3884_v1 = vld [vmem:[#allocation2 + $0x174] ss:$8 sps:$4 sm:$0xff]   ;;  %2468 = vmatprep.subr.bf16.mxu0 %v3882_v0  ;;  %v3887_v3 = vld [vmem:[#allocation2 + $0x170] ss:$8 sps:$4 sm:$0xff]   ;;  %v3888_v4 = vld [vmem:[#allocation2 + $0x64] ss:$8 sps:$4 sm:$0xff]  }
  0x4e   :  { %2509 = vmatprep.subr.bf16.mxu1 %v3884_v1  ;;  %2469 = vmatpush1.bf16.msra.mxu0 %v3886_v2  ;;  %v3890_v5 = vld [vmem:[#allocation2 + $0x164] ss:$8 sps:$4 sm:$0xff]   ;;  %v3892_v6 = vld [vmem:[#allocation2 + $0x60] ss:$8 sps:$4 sm:$0xff]   ;;  %v3894_v8 = vld [vmem:[#allocation2 + $0x54] ss:$8 sps:$4 sm:$0xff]  }
  0x4f   :  { %2510 = vmatpush1.bf16.msra.mxu1 %v3887_v3  ;;  %2470 = vmatprep.subr.bf16.mxu0 %v3888_v4  ;;  %v3893_v7 = vld [vmem:[#allocation2 + $0x160] ss:$8 sps:$4 sm:$0xff]   ;;  %v3896_v9 = vld [vmem:[#allocation2 + $0x154] ss:$8 sps:$4 sm:$0xff]   ;;  %v3898_v10 = vld [vmem:[#allocation2 + $0x50] ss:$8 sps:$4 sm:$0xff]  }
  0x50   :  { %2511 = vmatprep.subr.bf16.mxu1 %v3890_v5  ;;  %v3899_v11 = vld [vmem:[#allocation2 + $0x150] ss:$8 sps:$4 sm:$0xff]   ;;  %v3900_v12 = vld [vmem:[#allocation2 + $0x44] ss:$8 sps:$4 sm:$0xff]   ;;  %v3904_v14 = vld [vmem:[#allocation2 + $0x40] ss:$8 sps:$4 sm:$0xff]  }
  0x51   :  { %v3902_v13 = vld [vmem:[#allocation2 + $0x144] ss:$8 sps:$4 sm:$0xff]   ;;  %v3905_v15 = vld [vmem:[#allocation2 + $0x140] ss:$8 sps:$4 sm:$0xff]   ;;  %v3906_v16 = vld [vmem:[#allocation2 + $0x34] ss:$8 sps:$4 sm:$0xff]  }
  0x52   :  { %2471 = vmatpush1.bf16.msra.mxu0 %v3892_v6  ;;  %v3908_v17 = vld [vmem:[#allocation2 + $0x134] ss:$8 sps:$4 sm:$0xff]   ;;  %v3910_v18 = vld [vmem:[#allocation2 + $0x30] ss:$8 sps:$4 sm:$0xff]   ;;  %v3912_v20 = vld [vmem:[#allocation2 + $0x24] ss:$8 sps:$4 sm:$0xff]  }
  0x53   :  { %2512 = vmatpush1.bf16.msra.mxu1 %v3893_v7  ;;  %2472 = vmatprep.subr.bf16.mxu0 %v3894_v8  ;;  %v3911_v19 = vld [vmem:[#allocation2 + $0x130] ss:$8 sps:$4 sm:$0xff]   ;;  %v3914_v21 = vld [vmem:[#allocation2 + $0x124] ss:$8 sps:$4 sm:$0xff]   ;;  %v3916_v22 = vld [vmem:[#allocation2 + $0x20] ss:$8 sps:$4 sm:$0xff]  }
  0x54   :  { %2513 = vmatprep.subr.bf16.mxu1 %v3896_v9  ;;  %v3917_v23 = vld [vmem:[#allocation2 + $0x120] ss:$8 sps:$4 sm:$0xff]   ;;  %v3918_v24 = vld [vmem:[#allocation2 + $0x14] ss:$8 sps:$4 sm:$0xff]   ;;  %v3922_v26 = vld [vmem:[#allocation2 + $0x10] ss:$8 sps:$4 sm:$0xff]  }
  0x55   :  { %v3920_v25 = vld [vmem:[#allocation2 + $0x114] ss:$8 sps:$4 sm:$0xff]   ;;  %v3923_v27 = vld [vmem:[#allocation2 + $0x110] ss:$8 sps:$4 sm:$0xff]   ;;  %v3924_v28 = vld [vmem:[#allocation2 + $0x4] ss:$8 sps:$4 sm:$0xff]  }
  0x56   :  { %2473 = vmatpush1.bf16.msra.mxu0 %v3898_v10  ;;  %v3926_v29 = vld [vmem:[#allocation2 + $0x104] ss:$8 sps:$4 sm:$0xff]   ;;  %v3928_v30 = vld [vmem:[#allocation2] ss:$8 sps:$4 sm:$0xff]   ;;  %v3930_v32 = vld [vmem:[#allocation2 + $0xf4] ss:$8 sps:$4 sm:$0xff]  }
  0x57   :  { %2514 = vmatpush1.bf16.msra.mxu1 %v3899_v11  ;;  %2474 = vmatprep.subr.bf16.mxu0 %v3900_v12  ;;  %v3929_v31 = vld [vmem:[#allocation2 + $0x100] ss:$8 sps:$4 sm:$0xff]   ;;  %v3932_v33 = vld [vmem:[#allocation2 + $0x1f4] ss:$8 sps:$4 sm:$0xff]   ;;  %v3934_v34 = vld [vmem:[#allocation2 + $0xf0] ss:$8 sps:$4 sm:$0xff]  }
  0x58   :  { %2515 = vmatprep.subr.bf16.mxu1 %v3902_v13  ;;  %v3935_v35 = vld [vmem:[#allocation2 + $0x1f0] ss:$8 sps:$4 sm:$0xff]   ;;  %v3936_v36 = vld [vmem:[#allocation2 + $0xe4] ss:$8 sps:$4 sm:$0xff]   ;;  %v3940_v38 = vld [vmem:[#allocation2 + $0xe0] ss:$8 sps:$4 sm:$0xff]  }
  0x59   :  { %v3938_v37 = vld [vmem:[#allocation2 + $0x1e4] ss:$8 sps:$4 sm:$0xff]   ;;  %v3941_v39 = vld [vmem:[#allocation2 + $0x1e0] ss:$8 sps:$4 sm:$0xff]   ;;  %v3942_v40 = vld [vmem:[#allocation2 + $0xd4] ss:$8 sps:$4 sm:$0xff]  }
  0x5a   :  { %2475 = vmatpush1.bf16.msra.mxu0 %v3904_v14  ;;  %v3944_v41 = vld [vmem:[#allocation2 + $0x1d4] ss:$8 sps:$4 sm:$0xff]   ;;  %v3946_v42 = vld [vmem:[#allocation2 + $0xd0] ss:$8 sps:$4 sm:$0xff]   ;;  %v3948_v44 = vld [vmem:[#allocation2 + $0xc4] ss:$8 sps:$4 sm:$0xff]  }
  0x5b   :  { %2516 = vmatpush1.bf16.msra.mxu1 %v3905_v15  ;;  %2476 = vmatprep.subr.bf16.mxu0 %v3906_v16  ;;  %v3947_v43 = vld [vmem:[#allocation2 + $0x1d0] ss:$8 sps:$4 sm:$0xff]   ;;  %v3950_v45 = vld [vmem:[#allocation2 + $0x1c4] ss:$8 sps:$4 sm:$0xff]   ;;  %v3952_v47 = vld [vmem:[#allocation2 + $0xc0] ss:$8 sps:$4 sm:$0xff]  }
  0x5c   :  { %2517 = vmatprep.subr.bf16.mxu1 %v3908_v17  ;;  %v105_v46 = vld [vmem:[%s4850_s0 + $0x8] sm:$0xff]  ;;  %v107_v50 = vld [vmem:[%s4850_s0 + $0x18] sm:$0xff]  ;;  %v104_v4 = vld [vmem:[%s4850_s0] sm:$0xff] }
  0x5d   :  { %v3953_v48 = vld [vmem:[#allocation2 + $0x1c0] ss:$8 sps:$4 sm:$0xff]   ;;  %v129_v49 = vpack.c.bf16 %v105_v46, %v105_v46  ;;  %v3954_v51 = vld [vmem:[#allocation2 + $0xb4] ss:$8 sps:$4 sm:$0xff]   ;;  %v131_v52 = vpack.c.bf16 %v107_v50, %v107_v50  ;;  %v3958_v54 = vld [vmem:[#allocation2 + $0xb0] ss:$8 sps:$4 sm:$0xff]   ;;  %v128_v8 = vpack.c.bf16 %v104_v4, %v104_v4 }
  0x5e   :  { %2477 = vmatpush1.bf16.msra.mxu0 %v3910_v18  ;;  %v3956_v53 = vld [vmem:[#allocation2 + $0x1b4] ss:$8 sps:$4 sm:$0xff]   ;;  %v3959_v55 = vld [vmem:[#allocation2 + $0x1b0] ss:$8 sps:$4 sm:$0xff]   ;;  %v3960_v56 = vld [vmem:[#allocation2 + $0xa4] ss:$8 sps:$4 sm:$0xff]  }
  0x5f   :  { %2518 = vmatpush1.bf16.msra.mxu1 %v3911_v19  ;;  %2478 = vmatprep.subr.bf16.mxu0 %v3912_v20  ;;  %v3962_v57 = vld [vmem:[#allocation2 + $0x1a4] ss:$8 sps:$4 sm:$0xff]   ;;  %v3964_v58 = vld [vmem:[#allocation2 + $0xa0] ss:$8 sps:$4 sm:$0xff]   ;;  %v3966_v60 = vld [vmem:[#allocation2 + $0x94] ss:$8 sps:$4 sm:$0xff]  }
  0x60   :  { %2519 = vmatprep.subr.bf16.mxu1 %v3914_v21  ;;  %2500 = vmatprep.mubr.bf16.mxu0 %v129_v49  ;;  %v3965_v59 = vld [vmem:[#allocation2 + $0x1a0] ss:$8 sps:$4 sm:$0xff]   ;;  %v3968_v61 = vld [vmem:[#allocation2 + $0x194] ss:$8 sps:$4 sm:$0xff]   ;;  %v3970_v62 = vld [vmem:[#allocation2 + $0x90] ss:$8 sps:$4 sm:$0xff]  }
  0x61   :  { %2541 = vmatprep.mubr.bf16.mxu1 %v131_v52  ;;  %v3971_v63 = vld [vmem:[#allocation2 + $0x190] ss:$8 sps:$4 sm:$0xff]   ;;  %v3972_v0 = vld [vmem:[#allocation2 + $0x84] ss:$8 sps:$4 sm:$0xff]   ;;  %v3976_v2 = vld [vmem:[#allocation2 + $0x80] ss:$8 sps:$4 sm:$0xff]  }
  0x62   :  { %2479 = vmatpush1.bf16.msra.mxu0 %v3916_v22  ;;  %v3974_v1 = vld [vmem:[#allocation2 + $0x184] ss:$8 sps:$4 sm:$0xff]   ;;  %v3977_v3 = vld [vmem:[#allocation2 + $0x180] ss:$8 sps:$4 sm:$0xff]   ;;  %v106_v5 = vld [vmem:[%s4850_s0 + $0x10] sm:$0xff] }
  0x63   :  { %2520 = vmatpush1.bf16.msra.mxu1 %v3917_v23  ;;  %2480 = vmatprep.subr.bf16.mxu0 %v3918_v24  ;;  %v3980_v6 = vld [vmem:[#allocation2 + $0x274] ss:$8 sps:$4 sm:$0xff]   ;;  %v130_v9 = vpack.c.bf16 %v106_v5, %v106_v5  ;;  %v3978_v10 = vld [vmem:[#allocation2 + $0x270] ss:$8 sps:$4 sm:$0xff]   ;;  %v3986_v12 = vld [vmem:[#allocation2 + $0x264] ss:$8 sps:$4 sm:$0xff]  }
  0x64   :  { %2521 = vmatprep.subr.bf16.mxu1 %v3920_v25  ;;  %v3983_v7 = vld [vmem:[#allocation2 + $0x374] ss:$8 sps:$4 sm:$0xff]   ;;  %v3981_v11 = vld [vmem:[#allocation2 + $0x370] ss:$8 sps:$4 sm:$0xff]   ;;  %v3989_v13 = vld [vmem:[#allocation2 + $0x364] ss:$8 sps:$4 sm:$0xff]  }
  0x65   :  { %v3984_v14 = vld [vmem:[#allocation2 + $0x260] ss:$8 sps:$4 sm:$0xff]   ;;  %v3992_v16 = vld [vmem:[#allocation2 + $0x254] ss:$8 sps:$4 sm:$0xff]   ;;  %v3990_v18 = vld [vmem:[#allocation2 + $0x250] ss:$8 sps:$4 sm:$0xff]  }
  0x66   :  { %2481 = vmatpush1.bf16.msra.mxu0 %v3922_v26  ;;  %v3987_v15 = vld [vmem:[#allocation2 + $0x360] ss:$8 sps:$4 sm:$0xff]   ;;  %v3995_v17 = vld [vmem:[#allocation2 + $0x354] ss:$8 sps:$4 sm:$0xff]   ;;  %v3993_v19 = vld [vmem:[#allocation2 + $0x350] ss:$8 sps:$4 sm:$0xff]  }
  0x67   :  { %2522 = vmatpush1.bf16.msra.mxu1 %v3923_v27  ;;  %2482 = vmatprep.subr.bf16.mxu0 %v3924_v28  ;;  %v3998_v20 = vld [vmem:[#allocation2 + $0x244] ss:$8 sps:$4 sm:$0xff]   ;;  %v3996_v22 = vld [vmem:[#allocation2 + $0x240] ss:$8 sps:$4 sm:$0xff]   ;;  %v4004_v24 = vld [vmem:[#allocation2 + $0x234] ss:$8 sps:$4 sm:$0xff]  }
  0x68   :  { %2523 = vmatprep.subr.bf16.mxu1 %v3926_v29  ;;  %v4001_v21 = vld [vmem:[#allocation2 + $0x344] ss:$8 sps:$4 sm:$0xff]   ;;  %v3999_v23 = vld [vmem:[#allocation2 + $0x340] ss:$8 sps:$4 sm:$0xff]   ;;  %v4007_v25 = vld [vmem:[#allocation2 + $0x334] ss:$8 sps:$4 sm:$0xff]  }
  0x69   :  { %v4002_v26 = vld [vmem:[#allocation2 + $0x230] ss:$8 sps:$4 sm:$0xff]   ;;  %v4010_v28 = vld [vmem:[#allocation2 + $0x224] ss:$8 sps:$4 sm:$0xff]   ;;  %v4032_v50 = vld [vmem:[#allocation2 + $0x2e0] ss:$8 sps:$4 sm:$0xff]  }
  0x6a   :  { %2483 = vmatpush1.bf16.msra.mxu0 %v3928_v30  ;;  %v4005_v27 = vld [vmem:[#allocation2 + $0x330] ss:$8 sps:$4 sm:$0xff]   ;;  %v4013_v29 = vld [vmem:[#allocation2 + $0x324] ss:$8 sps:$4 sm:$0xff]   ;;  %v4008_v30 = vld [vmem:[#allocation2 + $0x220] ss:$8 sps:$4 sm:$0xff]  }
  0x6b   :  { %2524 = vmatpush1.bf16.msra.mxu1 %v3929_v31  ;;  %2484 = vmatprep.subr.bf16.mxu0 %v3930_v32  ;;  %v4011_v31 = vld [vmem:[#allocation2 + $0x320] ss:$8 sps:$4 sm:$0xff]   ;;  %v4016_v32 = vld [vmem:[#allocation2 + $0x214] ss:$8 sps:$4 sm:$0xff]   ;;  %v4026_v46 = vld [vmem:[#allocation2 + $0x2f0] ss:$8 sps:$4 sm:$0xff]  }
  0x6c   :  { %2525 = vmatprep.subr.bf16.mxu1 %v3932_v33  ;;  %v4019_v33 = vld [vmem:[#allocation2 + $0x314] ss:$8 sps:$4 sm:$0xff]   ;;  %v4037_v49 = vld [vmem:[#allocation2 + $0x3e4] ss:$8 sps:$4 sm:$0xff]  }
  0x6d   :  { %v4040_v52 = vld [vmem:[#allocation2 + $0x2d4] ss:$8 sps:$4 sm:$0xff]  }
  0x6e   :  { %2485 = vmatpush2.bf16.msra.mxu0 %v3934_v34  ;;  %v109_v34 = vld [vmem:[%s4850_s0 + $0x28] sm:$0xff]  ;;  %v4064_v4 = vld [vmem:[#allocation2 + $0x294] ss:$8 sps:$4 sm:$0xff]  }
  0x6f   :  { %2526 = vmatpush2.bf16.msra.mxu1 %v3935_v35  ;;  %2486 = vmatprep.subr.bf16.mxu0 %v3936_v36  ;;  %v4014_v35 = vld [vmem:[#allocation2 + $0x210] ss:$8 sps:$4 sm:$0xff]   ;;  %v4067_v5 = vld [vmem:[#allocation2 + $0x394] ss:$8 sps:$4 sm:$0xff]  }
  0x70   :  { %2527 = vmatprep.subr.bf16.mxu1 %v3938_v37  ;;  %v4017_v36 = vld [vmem:[#allocation2 + $0x310] ss:$8 sps:$4 sm:$0xff]   ;;  %v133_v37 = vpack.c.bf16 %v109_v34, %v109_v34  ;;  %v4092_v34 = vld [vmem:[#allocation2 + $0x440] ss:$8 sps:$4 sm:$0xff]  }
  0x72   :  { %2487 = vmatpush2.bf16.msra.mxu0 %v3940_v38  ;;  %v111_v38 = vld [vmem:[%s4850_s0 + $0x38] sm:$0xff] }
  0x73   :  { %2528 = vmatpush2.bf16.msra.mxu1 %v3941_v39  ;;  %2488 = vmatprep.subr.bf16.mxu0 %v3942_v40  ;;  %v4022_v39 = vld [vmem:[#allocation2 + $0x204] ss:$8 sps:$4 sm:$0xff]   ;;  %v135_v40 = vpack.c.bf16 %v111_v38, %v111_v38  ;;  %v4098_v38 = vld [vmem:[#allocation2 + $0x430] ss:$8 sps:$4 sm:$0xff]  }
  0x74   :  { %2529 = vmatprep.subr.bf16.mxu1 %v3944_v41  ;;  %v4025_v41 = vld [vmem:[#allocation2 + $0x304] ss:$8 sps:$4 sm:$0xff]  }
  0x76   :  { %2489 = vmatpush2.bf16.msra.mxu0 %v3946_v42  ;;  %v4020_v42 = vld [vmem:[#allocation2 + $0x200] ss:$8 sps:$4 sm:$0xff]  }
  0x77   :  { %2530 = vmatpush2.bf16.msra.mxu1 %v3947_v43  ;;  %2490 = vmatprep.subr.bf16.mxu0 %v3948_v44  ;;  %v4023_v43 = vld [vmem:[#allocation2 + $0x300] ss:$8 sps:$4 sm:$0xff]   ;;  %v4028_v44 = vld [vmem:[#allocation2 + $0x2f4] ss:$8 sps:$4 sm:$0xff]  }
  0x78   :  { %2531 = vmatprep.subr.bf16.mxu1 %v3950_v45  ;;  %v4031_v45 = vld [vmem:[#allocation2 + $0x3f4] ss:$8 sps:$4 sm:$0xff]  }
  0x7a   :  { %2491 = vmatpush2.bf16.msra.mxu0 %v3952_v47  ;;  %v4029_v47 = vld [vmem:[#allocation2 + $0x3f0] ss:$8 sps:$4 sm:$0xff]  }
  0x7b   :  { %2532 = vmatpush2.bf16.msra.mxu1 %v3953_v48  ;;  %2492 = vmatprep.subr.bf16.mxu0 %v3954_v51  ;;  %v4034_v48 = vld [vmem:[#allocation2 + $0x2e4] ss:$8 sps:$4 sm:$0xff]   ;;  %v4035_v51 = vld [vmem:[#allocation2 + $0x3e0] ss:$8 sps:$4 sm:$0xff]  }
  0x7c   :  { %2533 = vmatprep.subr.bf16.mxu1 %v3956_v53  ;;  %v4043_v53 = vld [vmem:[#allocation2 + $0x3d4] ss:$8 sps:$4 sm:$0xff]  }
  0x7e   :  { %2493 = vmatpush2.bf16.msra.mxu0 %v3958_v54  ;;  %v4038_v54 = vld [vmem:[#allocation2 + $0x2d0] ss:$8 sps:$4 sm:$0xff]  }
  0x7f   :  { %2534 = vmatpush2.bf16.msra.mxu1 %v3959_v55  ;;  %2494 = vmatprep.subr.bf16.mxu0 %v3960_v56  ;;  %v4041_v55 = vld [vmem:[#allocation2 + $0x3d0] ss:$8 sps:$4 sm:$0xff]   ;;  %v4046_v56 = vld [vmem:[#allocation2 + $0x2c4] ss:$8 sps:$4 sm:$0xff]  }
  0x80   :  { %2535 = vmatprep.subr.bf16.mxu1 %v3962_v57  ;;  %v4049_v57 = vld [vmem:[#allocation2 + $0x3c4] ss:$8 sps:$4 sm:$0xff]  }
  0x82   :  { %2495 = vmatpush2.bf16.msra.mxu0 %v3964_v58  ;;  %v4044_v58 = vld [vmem:[#allocation2 + $0x2c0] ss:$8 sps:$4 sm:$0xff]  }
  0x83   :  { %2536 = vmatpush2.bf16.msra.mxu1 %v3965_v59  ;;  %2496 = vmatprep.subr.bf16.mxu0 %v3966_v60  ;;  %v4047_v59 = vld [vmem:[#allocation2 + $0x3c0] ss:$8 sps:$4 sm:$0xff]   ;;  %v4052_v60 = vld [vmem:[#allocation2 + $0x2b4] ss:$8 sps:$4 sm:$0xff]  }
  0x84   :  { %2537 = vmatprep.subr.bf16.mxu1 %v3968_v61  ;;  %v4055_v61 = vld [vmem:[#allocation2 + $0x3b4] ss:$8 sps:$4 sm:$0xff]  }
  0x86   :  { %2497 = vmatpush2.bf16.msra.mxu0 %v3970_v62  ;;  %v4050_v62 = vld [vmem:[#allocation2 + $0x2b0] ss:$8 sps:$4 sm:$0xff]  }
  0x87   :  { %2538 = vmatpush2.bf16.msra.mxu1 %v3971_v63  ;;  %2498 = vmatprep.subr.bf16.mxu0 %v3972_v0  ;;  %v4053_v63 = vld [vmem:[#allocation2 + $0x3b0] ss:$8 sps:$4 sm:$0xff]   ;;  %v4058_v0 = vld [vmem:[#allocation2 + $0x2a4] ss:$8 sps:$4 sm:$0xff]  }
  0x88   :  { %2539 = vmatprep.subr.bf16.mxu1 %v3974_v1  ;;  %v4061_v1 = vld [vmem:[#allocation2 + $0x3a4] ss:$8 sps:$4 sm:$0xff]  }
  0x8a   :  { %2499 = vmatpush2.bf16.msra.mxu0 %v3976_v2  ;;  %v4056_v2 = vld [vmem:[#allocation2 + $0x2a0] ss:$8 sps:$4 sm:$0xff]  }
  0x8b   :  { %2540 = vmatpush2.bf16.msra.mxu1 %v3977_v3  ;;  %2550 = vmatprep.subr.bf16.mxu0 %v3980_v6  ;;  %v4059_v3 = vld [vmem:[#allocation2 + $0x3a0] ss:$8 sps:$4 sm:$0xff]   ;;  %v4062_v6 = vld [vmem:[#allocation2 + $0x290] ss:$8 sps:$4 sm:$0xff]  }
  0x8c   :  { %2591 = vmatprep.subr.bf16.mxu1 %v3983_v7  ;;  %v4065_v7 = vld [vmem:[#allocation2 + $0x390] ss:$8 sps:$4 sm:$0xff]  }
  0x8d   :  { %2501 = vmatmul.mubr.bf16.vlgmr.msra.gmra.mxu0 %v128_v8  ;;  %v4070_v8 = vld [vmem:[#allocation2 + $0x284] ss:$8 sps:$4 sm:$0xff]  }
  0x8e   :  { %2542 = vmatmul.mubr.bf16.vlgmr.msra.gmra.mxu1 %v130_v9  ;;  %2551 = vmatpush1.bf16.msra.mxu0 %v3978_v10  ;;  %v4073_v9 = vld [vmem:[#allocation2 + $0x384] ss:$8 sps:$4 sm:$0xff]   ;;  %v4068_v10 = vld [vmem:[#allocation2 + $0x280] ss:$8 sps:$4 sm:$0xff]  }
  0x8f   :  { %2592 = vmatpush1.bf16.msra.mxu1 %v3981_v11  ;;  %2552 = vmatprep.subr.bf16.mxu0 %v3986_v12  ;;  %v4071_v11 = vld [vmem:[#allocation2 + $0x380] ss:$8 sps:$4 sm:$0xff]  }
  0x90   :  { %2593 = vmatprep.subr.bf16.mxu1 %v3989_v13  ;;  %2582 = vmatprep.mubr.bf16.mxu0 %v133_v37  ;;  %v108_v12 = vld [vmem:[%s4850_s0 + $0x20] sm:$0xff]  ;;  %v110_v13 = vld [vmem:[%s4850_s0 + $0x30] sm:$0xff] }
  0x91   :  { %2623 = vmatprep.mubr.bf16.mxu1 %v135_v40  ;;  %v4103_v37 = vld [vmem:[#allocation2 + $0x534] ss:$8 sps:$4 sm:$0xff]   ;;  %v4106_v40 = vld [vmem:[#allocation2 + $0x424] ss:$8 sps:$4 sm:$0xff]  }
  0x92   :  { %2553 = vmatpush1.bf16.msra.mxu0 %v3984_v14  ;;  %v4076_v14 = vld [vmem:[#allocation2 + $0x474] ss:$8 sps:$4 sm:$0xff]  }
  0x93   :  { %2594 = vmatpush1.bf16.msra.mxu1 %v3987_v15  ;;  %2554 = vmatprep.subr.bf16.mxu0 %v3992_v16  ;;  %v4079_v15 = vld [vmem:[#allocation2 + $0x574] ss:$8 sps:$4 sm:$0xff]   ;;  %v132_v16 = vpack.c.bf16 %v108_v12, %v108_v12 }
  0x94   :  { %2595 = vmatprep.subr.bf16.mxu1 %v3995_v17  ;;  %v134_v17 = vpack.c.bf16 %v110_v13, %v110_v13  ;;  %v4160_v12 = vld [vmem:[#allocation2 + $0x494] ss:$8 sps:$4 sm:$0xff]  }
  0x95   :  { %v4163_v13 = vld [vmem:[#allocation2 + $0x594] ss:$8 sps:$4 sm:$0xff]  }
  0x96   :  { %2555 = vmatpush1.bf16.msra.mxu0 %v3990_v18  ;;  %v4074_v18 = vld [vmem:[#allocation2 + $0x470] ss:$8 sps:$4 sm:$0xff]  }
  0x97   :  { %2596 = vmatpush1.bf16.msra.mxu1 %v3993_v19  ;;  %2556 = vmatprep.subr.bf16.mxu0 %v3998_v20  ;;  %v4077_v19 = vld [vmem:[#allocation2 + $0x570] ss:$8 sps:$4 sm:$0xff]   ;;  %v4082_v20 = vld [vmem:[#allocation2 + $0x464] ss:$8 sps:$4 sm:$0xff]  }
  0x98   :  { %2597 = vmatprep.subr.bf16.mxu1 %v4001_v21  ;;  %v4085_v21 = vld [vmem:[#allocation2 + $0x564] ss:$8 sps:$4 sm:$0xff]  }
  0x9a   :  { %2557 = vmatpush1.bf16.msra.mxu0 %v3996_v22  ;;  %v113_v22 = vld [vmem:[%s4850_s0 + $0x48] sm:$0xff] }
  0x9b   :  { %2598 = vmatpush1.bf16.msra.mxu1 %v3999_v23  ;;  %2558 = vmatprep.subr.bf16.mxu0 %v4004_v24  ;;  %v4080_v23 = vld [vmem:[#allocation2 + $0x460] ss:$8 sps:$4 sm:$0xff]  }
  0x9c   :  { %2599 = vmatprep.subr.bf16.mxu1 %v4007_v25  ;;  %v4083_v24 = vld [vmem:[#allocation2 + $0x560] ss:$8 sps:$4 sm:$0xff]   ;;  %v137_v25 = vpack.c.bf16 %v113_v22, %v113_v22  ;;  %v4172_v22 = vld [vmem:[#allocation2 + $0x674] ss:$8 sps:$4 sm:$0xff]  }
  0x9e   :  { %2559 = vmatpush1.bf16.msra.mxu0 %v4002_v26  ;;  %v115_v26 = vld [vmem:[%s4850_s0 + $0x58] sm:$0xff] }
  0x9f   :  { %2600 = vmatpush1.bf16.msra.mxu1 %v4005_v27  ;;  %2560 = vmatprep.subr.bf16.mxu0 %v4010_v28  ;;  %v4088_v27 = vld [vmem:[#allocation2 + $0x454] ss:$8 sps:$4 sm:$0xff]   ;;  %v139_v28 = vpack.c.bf16 %v115_v26, %v115_v26 }
  0xa0   :  { %2601 = vmatprep.subr.bf16.mxu1 %v4013_v29  ;;  %v4091_v29 = vld [vmem:[#allocation2 + $0x554] ss:$8 sps:$4 sm:$0xff]  }
  0xa2   :  { %2561 = vmatpush1.bf16.msra.mxu0 %v4008_v30  ;;  %v4086_v30 = vld [vmem:[#allocation2 + $0x450] ss:$8 sps:$4 sm:$0xff]  }
  0xa3   :  { %2602 = vmatpush1.bf16.msra.mxu1 %v4011_v31  ;;  %2562 = vmatprep.subr.bf16.mxu0 %v4016_v32  ;;  %v4089_v31 = vld [vmem:[#allocation2 + $0x550] ss:$8 sps:$4 sm:$0xff]   ;;  %v4094_v32 = vld [vmem:[#allocation2 + $0x444] ss:$8 sps:$4 sm:$0xff]  }
  0xa4   :  { %2603 = vmatprep.subr.bf16.mxu1 %v4019_v33  ;;  %v4097_v33 = vld [vmem:[#allocation2 + $0x544] ss:$8 sps:$4 sm:$0xff]  }
  0xa6   :  { %2563 = vmatpush1.bf16.msra.mxu0 %v4014_v35  ;;  %v4095_v35 = vld [vmem:[#allocation2 + $0x540] ss:$8 sps:$4 sm:$0xff]  }
  0xa7   :  { %2604 = vmatpush1.bf16.msra.mxu1 %v4017_v36  ;;  %2564 = vmatprep.subr.bf16.mxu0 %v4022_v39  ;;  %v4100_v36 = vld [vmem:[#allocation2 + $0x434] ss:$8 sps:$4 sm:$0xff]   ;;  %v4101_v39 = vld [vmem:[#allocation2 + $0x530] ss:$8 sps:$4 sm:$0xff]  }
  0xa8   :  { %2605 = vmatprep.subr.bf16.mxu1 %v4025_v41  ;;  %v4109_v41 = vld [vmem:[#allocation2 + $0x524] ss:$8 sps:$4 sm:$0xff]  }
  0xaa   :  { %2565 = vmatpush1.bf16.msra.mxu0 %v4020_v42  ;;  %v4104_v42 = vld [vmem:[#allocation2 + $0x420] ss:$8 sps:$4 sm:$0xff]  }
  0xab   :  { %2606 = vmatpush1.bf16.msra.mxu1 %v4023_v43  ;;  %2566 = vmatprep.subr.bf16.mxu0 %v4028_v44  ;;  %v4107_v43 = vld [vmem:[#allocation2 + $0x520] ss:$8 sps:$4 sm:$0xff]   ;;  %v4112_v44 = vld [vmem:[#allocation2 + $0x414] ss:$8 sps:$4 sm:$0xff]  }
  0xac   :  { %2607 = vmatprep.subr.bf16.mxu1 %v4031_v45  ;;  %v4115_v45 = vld [vmem:[#allocation2 + $0x514] ss:$8 sps:$4 sm:$0xff]  }
  0xae   :  { %2567 = vmatpush2.bf16.msra.mxu0 %v4026_v46  ;;  %v4110_v46 = vld [vmem:[#allocation2 + $0x410] ss:$8 sps:$4 sm:$0xff]  }
  0xaf   :  { %2608 = vmatpush2.bf16.msra.mxu1 %v4029_v47  ;;  %2568 = vmatprep.subr.bf16.mxu0 %v4034_v48  ;;  %v4113_v47 = vld [vmem:[#allocation2 + $0x510] ss:$8 sps:$4 sm:$0xff]   ;;  %v4118_v48 = vld [vmem:[#allocation2 + $0x404] ss:$8 sps:$4 sm:$0xff]  }
  0xb0   :  { %2609 = vmatprep.subr.bf16.mxu1 %v4037_v49  ;;  %v4121_v49 = vld [vmem:[#allocation2 + $0x504] ss:$8 sps:$4 sm:$0xff]  }
  0xb2   :  { %2569 = vmatpush2.bf16.msra.mxu0 %v4032_v50  ;;  %v4116_v50 = vld [vmem:[#allocation2 + $0x400] ss:$8 sps:$4 sm:$0xff]  }
  0xb3   :  { %2610 = vmatpush2.bf16.msra.mxu1 %v4035_v51  ;;  %2570 = vmatprep.subr.bf16.mxu0 %v4040_v52  ;;  %v4119_v51 = vld [vmem:[#allocation2 + $0x500] ss:$8 sps:$4 sm:$0xff]   ;;  %v4124_v52 = vld [vmem:[#allocation2 + $0x4f4] ss:$8 sps:$4 sm:$0xff]  }
  0xb4   :  { %2611 = vmatprep.subr.bf16.mxu1 %v4043_v53  ;;  %v4127_v53 = vld [vmem:[#allocation2 + $0x5f4] ss:$8 sps:$4 sm:$0xff]  }
  0xb6   :  { %2571 = vmatpush2.bf16.msra.mxu0 %v4038_v54  ;;  %v4122_v54 = vld [vmem:[#allocation2 + $0x4f0] ss:$8 sps:$4 sm:$0xff]  }
  0xb7   :  { %2612 = vmatpush2.bf16.msra.mxu1 %v4041_v55  ;;  %2572 = vmatprep.subr.bf16.mxu0 %v4046_v56  ;;  %v4125_v55 = vld [vmem:[#allocation2 + $0x5f0] ss:$8 sps:$4 sm:$0xff]   ;;  %v4130_v56 = vld [vmem:[#allocation2 + $0x4e4] ss:$8 sps:$4 sm:$0xff]  }
  0xb8   :  { %2613 = vmatprep.subr.bf16.mxu1 %v4049_v57  ;;  %v4133_v57 = vld [vmem:[#allocation2 + $0x5e4] ss:$8 sps:$4 sm:$0xff]  }
  0xba   :  { %2573 = vmatpush2.bf16.msra.mxu0 %v4044_v58  ;;  %v4128_v58 = vld [vmem:[#allocation2 + $0x4e0] ss:$8 sps:$4 sm:$0xff]  }
  0xbb   :  { %2614 = vmatpush2.bf16.msra.mxu1 %v4047_v59  ;;  %2574 = vmatprep.subr.bf16.mxu0 %v4052_v60  ;;  %v4131_v59 = vld [vmem:[#allocation2 + $0x5e0] ss:$8 sps:$4 sm:$0xff]   ;;  %v4136_v60 = vld [vmem:[#allocation2 + $0x4d4] ss:$8 sps:$4 sm:$0xff]  }
  0xbc   :  { %2615 = vmatprep.subr.bf16.mxu1 %v4055_v61  ;;  %v4139_v61 = vld [vmem:[#allocation2 + $0x5d4] ss:$8 sps:$4 sm:$0xff]  }
  0xbe   :  { %2575 = vmatpush2.bf16.msra.mxu0 %v4050_v62  ;;  %v4134_v62 = vld [vmem:[#allocation2 + $0x4d0] ss:$8 sps:$4 sm:$0xff]  }
  0xbf   :  { %2616 = vmatpush2.bf16.msra.mxu1 %v4053_v63  ;;  %2576 = vmatprep.subr.bf16.mxu0 %v4058_v0  ;;  %v4137_v63 = vld [vmem:[#allocation2 + $0x5d0] ss:$8 sps:$4 sm:$0xff]   ;;  %v4142_v0 = vld [vmem:[#allocation2 + $0x4c4] ss:$8 sps:$4 sm:$0xff]  }
  0xc0   :  { %2617 = vmatprep.subr.bf16.mxu1 %v4061_v1  ;;  %v4145_v1 = vld [vmem:[#allocation2 + $0x5c4] ss:$8 sps:$4 sm:$0xff]  }
  0xc2   :  { %2577 = vmatpush2.bf16.msra.mxu0 %v4056_v2  ;;  %v4140_v2 = vld [vmem:[#allocation2 + $0x4c0] ss:$8 sps:$4 sm:$0xff]  }
  0xc3   :  { %2618 = vmatpush2.bf16.msra.mxu1 %v4059_v3  ;;  %2578 = vmatprep.subr.bf16.mxu0 %v4064_v4  ;;  %v4143_v3 = vld [vmem:[#allocation2 + $0x5c0] ss:$8 sps:$4 sm:$0xff]   ;;  %v4148_v4 = vld [vmem:[#allocation2 + $0x4b4] ss:$8 sps:$4 sm:$0xff]  }
  0xc4   :  { %2619 = vmatprep.subr.bf16.mxu1 %v4067_v5  ;;  %v4151_v5 = vld [vmem:[#allocation2 + $0x5b4] ss:$8 sps:$4 sm:$0xff]  }
  0xc6   :  { %2579 = vmatpush2.bf16.msra.mxu0 %v4062_v6  ;;  %v4146_v6 = vld [vmem:[#allocation2 + $0x4b0] ss:$8 sps:$4 sm:$0xff]  }
  0xc7   :  { %2620 = vmatpush2.bf16.msra.mxu1 %v4065_v7  ;;  %2580 = vmatprep.subr.bf16.mxu0 %v4070_v8  ;;  %v4149_v7 = vld [vmem:[#allocation2 + $0x5b0] ss:$8 sps:$4 sm:$0xff]   ;;  %v4154_v8 = vld [vmem:[#allocation2 + $0x4a4] ss:$8 sps:$4 sm:$0xff]  }
  0xc8   :  { %2621 = vmatprep.subr.bf16.mxu1 %v4073_v9  ;;  %v4157_v9 = vld [vmem:[#allocation2 + $0x5a4] ss:$8 sps:$4 sm:$0xff]  }
  0xca   :  { %2581 = vmatpush2.bf16.msra.mxu0 %v4068_v10  ;;  %v4152_v10 = vld [vmem:[#allocation2 + $0x4a0] ss:$8 sps:$4 sm:$0xff]  }
  0xcb   :  { %2622 = vmatpush2.bf16.msra.mxu1 %v4071_v11  ;;  %2632 = vmatprep.subr.bf16.mxu0 %v4076_v14  ;;  %v4155_v11 = vld [vmem:[#allocation2 + $0x5a0] ss:$8 sps:$4 sm:$0xff]   ;;  %v4158_v14 = vld [vmem:[#allocation2 + $0x490] ss:$8 sps:$4 sm:$0xff]  }
  0xcc   :  { %2673 = vmatprep.subr.bf16.mxu1 %v4079_v15  ;;  %v4161_v15 = vld [vmem:[#allocation2 + $0x590] ss:$8 sps:$4 sm:$0xff]  }
  0xcd   :  { %2583 = vmatmul.mubr.bf16.vlgmr.msra.gmra.mxu0 %v132_v16  ;;  %v4166_v16 = vld [vmem:[#allocation2 + $0x484] ss:$8 sps:$4 sm:$0xff]  }
  0xce   :  { %2624 = vmatmul.mubr.bf16.vlgmr.msra.gmra.mxu1 %v134_v17  ;;  %2633 = vmatpush1.bf16.msra.mxu0 %v4074_v18  ;;  %v4169_v17 = vld [vmem:[#allocation2 + $0x584] ss:$8 sps:$4 sm:$0xff]   ;;  %v4164_v18 = vld [vmem:[#allocation2 + $0x480] ss:$8 sps:$4 sm:$0xff]  }
  0xcf   :  { %2674 = vmatpush1.bf16.msra.mxu1 %v4077_v19  ;;  %2634 = vmatprep.subr.bf16.mxu0 %v4082_v20  ;;  %v4167_v19 = vld [vmem:[#allocation2 + $0x580] ss:$8 sps:$4 sm:$0xff]  }
  0xd0   :  { %2675 = vmatprep.subr.bf16.mxu1 %v4085_v21  ;;  %2664 = vmatprep.mubr.bf16.mxu0 %v137_v25  ;;  %v112_v20 = vld [vmem:[%s4850_s0 + $0x40] sm:$0xff]  ;;  %v114_v21 = vld [vmem:[%s4850_s0 + $0x50] sm:$0xff]  ;;  %v117_v25 = vld [vmem:[%s4850_s0 + $0x68] sm:$0xff] }
  0xd1   :  { %2705 = vmatprep.mubr.bf16.mxu1 %v139_v28  ;;  %v136_v26 = vpack.c.bf16 %v112_v20, %v112_v20  ;;  %v119_v28 = vld [vmem:[%s4850_s0 + $0x78] sm:$0xff]  ;;  %v538_v20 = vlaneseq }
  0xd2   :  { %2635 = vmatpush1.bf16.msra.mxu0 %v4080_v23  ;;  %v4175_v23 = vld [vmem:[#allocation2 + $0x774] ss:$8 sps:$4 sm:$0xff]  }
  0xd3   :  { %2676 = vmatpush1.bf16.msra.mxu1 %v4083_v24  ;;  %2636 = vmatprep.subr.bf16.mxu0 %v4088_v27  ;;  %v4170_v24 = vld [vmem:[#allocation2 + $0x670] ss:$8 sps:$4 sm:$0xff]   ;;  %v138_v27 = vpack.c.bf16 %v114_v21, %v114_v21  ;;  %v4256_v21 = vld [vmem:[#allocation2 + $0x694] ss:$8 sps:$4 sm:$0xff]  }
  0xd4   :  { %2677 = vmatprep.subr.bf16.mxu1 %v4091_v29  ;;  %v4173_v29 = vld [vmem:[#allocation2 + $0x770] ss:$8 sps:$4 sm:$0xff]  }
  0xd6   :  { %2637 = vmatpush1.bf16.msra.mxu0 %v4086_v30  ;;  %v4178_v30 = vld [vmem:[#allocation2 + $0x664] ss:$8 sps:$4 sm:$0xff]  }
  0xd7   :  { %2678 = vmatpush1.bf16.msra.mxu1 %v4089_v31  ;;  %2638 = vmatprep.subr.bf16.mxu0 %v4094_v32  ;;  %v4181_v31 = vld [vmem:[#allocation2 + $0x764] ss:$8 sps:$4 sm:$0xff]   ;;  %v141_v32 = vpack.c.bf16 %v117_v25, %v117_v25  ;;  %v4787_v25 = vshrl.u32 %v538_v20, 7 }
  0xd8   :  { %2679 = vmatprep.subr.bf16.mxu1 %v4097_v33  ;;  %v143_v33 = vpack.c.bf16 %v119_v28, %v119_v28  ;;  %v4260_v28 = vld [vmem:[#allocation2 + $0x680] ss:$8 sps:$4 sm:$0xff]   ;;  %v4313_v20 = vld [vmem:[#allocation2 + $0x904] ss:$8 sps:$4 sm:$0xff]  }
  0xda   :  { %2639 = vmatpush1.bf16.msra.mxu0 %v4092_v34  ;;  %v4176_v34 = vld [vmem:[#allocation2 + $0x660] ss:$8 sps:$4 sm:$0xff]  }
  0xdb   :  { %2680 = vmatpush1.bf16.msra.mxu1 %v4095_v35  ;;  %2640 = vmatprep.subr.bf16.mxu0 %v4100_v36  ;;  %v4179_v35 = vld [vmem:[#allocation2 + $0x760] ss:$8 sps:$4 sm:$0xff]   ;;  %v4184_v36 = vld [vmem:[#allocation2 + $0x654] ss:$8 sps:$4 sm:$0xff]  }
  0xdc   :  { %2681 = vmatprep.subr.bf16.mxu1 %v4103_v37  ;;  %v4187_v37 = vld [vmem:[#allocation2 + $0x754] ss:$8 sps:$4 sm:$0xff]  }
  0xde   :  { %2641 = vmatpush1.bf16.msra.mxu0 %v4098_v38  ;;  %v4182_v38 = vld [vmem:[#allocation2 + $0x650] ss:$8 sps:$4 sm:$0xff]  }
  0xdf   :  { %2682 = vmatpush1.bf16.msra.mxu1 %v4101_v39  ;;  %2642 = vmatprep.subr.bf16.mxu0 %v4106_v40  ;;  %v4185_v39 = vld [vmem:[#allocation2 + $0x750] ss:$8 sps:$4 sm:$0xff]   ;;  %v4190_v40 = vld [vmem:[#allocation2 + $0x644] ss:$8 sps:$4 sm:$0xff]  }
  0xe0   :  { %2683 = vmatprep.subr.bf16.mxu1 %v4109_v41  ;;  %v4193_v41 = vld [vmem:[#allocation2 + $0x744] ss:$8 sps:$4 sm:$0xff]  }
  0xe2   :  { %2643 = vmatpush1.bf16.msra.mxu0 %v4104_v42  ;;  %v4188_v42 = vld [vmem:[#allocation2 + $0x640] ss:$8 sps:$4 sm:$0xff]  }
  0xe3   :  { %2684 = vmatpush1.bf16.msra.mxu1 %v4107_v43  ;;  %2644 = vmatprep.subr.bf16.mxu0 %v4112_v44  ;;  %v4191_v43 = vld [vmem:[#allocation2 + $0x740] ss:$8 sps:$4 sm:$0xff]   ;;  %v4196_v44 = vld [vmem:[#allocation2 + $0x634] ss:$8 sps:$4 sm:$0xff]  }
  0xe4   :  { %2685 = vmatprep.subr.bf16.mxu1 %v4115_v45  ;;  %v4199_v45 = vld [vmem:[#allocation2 + $0x734] ss:$8 sps:$4 sm:$0xff]  }
  0xe6   :  { %2645 = vmatpush1.bf16.msra.mxu0 %v4110_v46  ;;  %v4194_v46 = vld [vmem:[#allocation2 + $0x630] ss:$8 sps:$4 sm:$0xff]  }
  0xe7   :  { %2686 = vmatpush1.bf16.msra.mxu1 %v4113_v47  ;;  %2646 = vmatprep.subr.bf16.mxu0 %v4118_v48  ;;  %v4197_v47 = vld [vmem:[#allocation2 + $0x730] ss:$8 sps:$4 sm:$0xff]   ;;  %v4202_v48 = vld [vmem:[#allocation2 + $0x624] ss:$8 sps:$4 sm:$0xff]  }
  0xe8   :  { %2687 = vmatprep.subr.bf16.mxu1 %v4121_v49  ;;  %v4205_v49 = vld [vmem:[#allocation2 + $0x724] ss:$8 sps:$4 sm:$0xff]  }
  0xea   :  { %2647 = vmatpush1.bf16.msra.mxu0 %v4116_v50  ;;  %v4200_v50 = vld [vmem:[#allocation2 + $0x620] ss:$8 sps:$4 sm:$0xff]  }
  0xeb   :  { %2688 = vmatpush1.bf16.msra.mxu1 %v4119_v51  ;;  %2648 = vmatprep.subr.bf16.mxu0 %v4124_v52  ;;  %v4203_v51 = vld [vmem:[#allocation2 + $0x720] ss:$8 sps:$4 sm:$0xff]   ;;  %v4208_v52 = vld [vmem:[#allocation2 + $0x614] ss:$8 sps:$4 sm:$0xff]  }
  0xec   :  { %2689 = vmatprep.subr.bf16.mxu1 %v4127_v53  ;;  %v4211_v53 = vld [vmem:[#allocation2 + $0x714] ss:$8 sps:$4 sm:$0xff]  }
  0xee   :  { %2649 = vmatpush2.bf16.msra.mxu0 %v4122_v54  ;;  %v4206_v54 = vld [vmem:[#allocation2 + $0x610] ss:$8 sps:$4 sm:$0xff]  }
  0xef   :  { %2690 = vmatpush2.bf16.msra.mxu1 %v4125_v55  ;;  %2650 = vmatprep.subr.bf16.mxu0 %v4130_v56  ;;  %v4209_v55 = vld [vmem:[#allocation2 + $0x710] ss:$8 sps:$4 sm:$0xff]   ;;  %v4214_v56 = vld [vmem:[#allocation2 + $0x604] ss:$8 sps:$4 sm:$0xff]  }
  0xf0   :  { %2691 = vmatprep.subr.bf16.mxu1 %v4133_v57  ;;  %v4217_v57 = vld [vmem:[#allocation2 + $0x704] ss:$8 sps:$4 sm:$0xff]  }
  0xf2   :  { %2651 = vmatpush2.bf16.msra.mxu0 %v4128_v58  ;;  %v4212_v58 = vld [vmem:[#allocation2 + $0x600] ss:$8 sps:$4 sm:$0xff]  }
  0xf3   :  { %2692 = vmatpush2.bf16.msra.mxu1 %v4131_v59  ;;  %2652 = vmatprep.subr.bf16.mxu0 %v4136_v60  ;;  %v4215_v59 = vld [vmem:[#allocation2 + $0x700] ss:$8 sps:$4 sm:$0xff]   ;;  %v4220_v60 = vld [vmem:[#allocation2 + $0x6f4] ss:$8 sps:$4 sm:$0xff]  }
  0xf4   :  { %2693 = vmatprep.subr.bf16.mxu1 %v4139_v61  ;;  %v4223_v61 = vld [vmem:[#allocation2 + $0x7f4] ss:$8 sps:$4 sm:$0xff]  }
  0xf6   :  { %2653 = vmatpush2.bf16.msra.mxu0 %v4134_v62  ;;  %v4218_v62 = vld [vmem:[#allocation2 + $0x6f0] ss:$8 sps:$4 sm:$0xff]  }
  0xf7   :  { %2694 = vmatpush2.bf16.msra.mxu1 %v4137_v63  ;;  %2654 = vmatprep.subr.bf16.mxu0 %v4142_v0  ;;  %v4221_v63 = vld [vmem:[#allocation2 + $0x7f0] ss:$8 sps:$4 sm:$0xff]   ;;  %v4226_v0 = vld [vmem:[#allocation2 + $0x6e4] ss:$8 sps:$4 sm:$0xff]  }
  0xf8   :  { %2695 = vmatprep.subr.bf16.mxu1 %v4145_v1  ;;  %v4229_v1 = vld [vmem:[#allocation2 + $0x7e4] ss:$8 sps:$4 sm:$0xff]  }
  0xfa   :  { %2655 = vmatpush2.bf16.msra.mxu0 %v4140_v2  ;;  %v4224_v2 = vld [vmem:[#allocation2 + $0x6e0] ss:$8 sps:$4 sm:$0xff]  }
  0xfb   :  { %2696 = vmatpush2.bf16.msra.mxu1 %v4143_v3  ;;  %2656 = vmatprep.subr.bf16.mxu0 %v4148_v4  ;;  %v4227_v3 = vld [vmem:[#allocation2 + $0x7e0] ss:$8 sps:$4 sm:$0xff]   ;;  %v4232_v4 = vld [vmem:[#allocation2 + $0x6d4] ss:$8 sps:$4 sm:$0xff]  }
  0xfc   :  { %2697 = vmatprep.subr.bf16.mxu1 %v4151_v5  ;;  %v4235_v5 = vld [vmem:[#allocation2 + $0x7d4] ss:$8 sps:$4 sm:$0xff]  }
  0xfe   :  { %2657 = vmatpush2.bf16.msra.mxu0 %v4146_v6  ;;  %v4230_v6 = vld [vmem:[#allocation2 + $0x6d0] ss:$8 sps:$4 sm:$0xff]  }
  0xff   :  { %2698 = vmatpush2.bf16.msra.mxu1 %v4149_v7  ;;  %2658 = vmatprep.subr.bf16.mxu0 %v4154_v8  ;;  %v4233_v7 = vld [vmem:[#allocation2 + $0x7d0] ss:$8 sps:$4 sm:$0xff]   ;;  %v4238_v8 = vld [vmem:[#allocation2 + $0x6c4] ss:$8 sps:$4 sm:$0xff]  }
 0x100   :  { %2699 = vmatprep.subr.bf16.mxu1 %v4157_v9  ;;  %v4241_v9 = vld [vmem:[#allocation2 + $0x7c4] ss:$8 sps:$4 sm:$0xff]  }
 0x102   :  { %2659 = vmatpush2.bf16.msra.mxu0 %v4152_v10  ;;  %v4236_v10 = vld [vmem:[#allocation2 + $0x6c0] ss:$8 sps:$4 sm:$0xff]  }
 0x103   :  { %2700 = vmatpush2.bf16.msra.mxu1 %v4155_v11  ;;  %2660 = vmatprep.subr.bf16.mxu0 %v4160_v12  ;;  %v4239_v11 = vld [vmem:[#allocation2 + $0x7c0] ss:$8 sps:$4 sm:$0xff]   ;;  %v4244_v12 = vld [vmem:[#allocation2 + $0x6b4] ss:$8 sps:$4 sm:$0xff]  }
 0x104   :  { %2701 = vmatprep.subr.bf16.mxu1 %v4163_v13  ;;  %v4247_v13 = vld [vmem:[#allocation2 + $0x7b4] ss:$8 sps:$4 sm:$0xff]  }
 0x106   :  { %2661 = vmatpush2.bf16.msra.mxu0 %v4158_v14  ;;  %v4242_v14 = vld [vmem:[#allocation2 + $0x6b0] ss:$8 sps:$4 sm:$0xff]  }
 0x107   :  { %2702 = vmatpush2.bf16.msra.mxu1 %v4161_v15  ;;  %2662 = vmatprep.subr.bf16.mxu0 %v4166_v16  ;;  %v4245_v15 = vld [vmem:[#allocation2 + $0x7b0] ss:$8 sps:$4 sm:$0xff]   ;;  %v4250_v16 = vld [vmem:[#allocation2 + $0x6a4] ss:$8 sps:$4 sm:$0xff]  }
 0x108   :  { %2703 = vmatprep.subr.bf16.mxu1 %v4169_v17  ;;  %v4253_v17 = vld [vmem:[#allocation2 + $0x7a4] ss:$8 sps:$4 sm:$0xff]  }
 0x10a   :  { %2663 = vmatpush2.bf16.msra.mxu0 %v4164_v18  ;;  %v4248_v18 = vld [vmem:[#allocation2 + $0x6a0] ss:$8 sps:$4 sm:$0xff]  }
 0x10b   :  { %2704 = vmatpush2.bf16.msra.mxu1 %v4167_v19  ;;  %2714 = vmatprep.subr.bf16.mxu0 %v4172_v22  ;;  %v4251_v19 = vld [vmem:[#allocation2 + $0x7a0] ss:$8 sps:$4 sm:$0xff]   ;;  %v4259_v22 = vld [vmem:[#allocation2 + $0x794] ss:$8 sps:$4 sm:$0xff]  }
 0x10c   :  { %2755 = vmatprep.subr.bf16.mxu1 %v4175_v23  ;;  %v4254_v23 = vld [vmem:[#allocation2 + $0x690] ss:$8 sps:$4 sm:$0xff]  }
 0x10d   :  { %2665 = vmatmul.mubr.bf16.vlgmr.msra.gmra.mxu0 %v136_v26  ;;  %v4262_v26 = vld [vmem:[#allocation2 + $0x684] ss:$8 sps:$4 sm:$0xff]  }
 0x10e   :  { %2706 = vmatmul.mubr.bf16.vlgmr.msra.gmra.mxu1 %v138_v27  ;;  %2715 = vmatpush1.bf16.msra.mxu0 %v4170_v24  ;;  %v4257_v24 = vld [vmem:[#allocation2 + $0x790] ss:$8 sps:$4 sm:$0xff]   ;;  %v4265_v27 = vld [vmem:[#allocation2 + $0x784] ss:$8 sps:$4 sm:$0xff]  }
 0x10f   :  { %2756 = vmatpush1.bf16.msra.mxu1 %v4173_v29  ;;  %2716 = vmatprep.subr.bf16.mxu0 %v4178_v30  ;;  %v4263_v29 = vld [vmem:[#allocation2 + $0x780] ss:$8 sps:$4 sm:$0xff]  }
 0x110   :  { %2757 = vmatprep.subr.bf16.mxu1 %v4181_v31  ;;  %2746 = vmatprep.mubr.bf16.mxu0 %v141_v32  ;;  %v536_v30 = vld [vmem:[#allocation5] sm:$0x3]  ;;  %v540_v32 = vsub.s32 0, %v4787_v25 }
 0x111   :  { %2787 = vmatprep.mubr.bf16.mxu1 %v143_v33  ;;  %v116_v31 = vld [vmem:[%s4850_s0 + $0x60] sm:$0xff]  ;;  %v118_v33 = vld [vmem:[%s4850_s0 + $0x70] sm:$0xff] }
 0x112   :  { %2717 = vmatpush1.bf16.msra.mxu0 %v4176_v34  ;;  %v4268_v34 = vld [vmem:[#allocation2 + $0x874] ss:$8 sps:$4 sm:$0xff]  }
 0x113   :  { %2758 = vmatpush1.bf16.msra.mxu1 %v4179_v35  ;;  %2718 = vmatprep.subr.bf16.mxu0 %v4184_v36  ;;  %v4271_v35 = vld [vmem:[#allocation2 + $0x974] ss:$8 sps:$4 sm:$0xff]   ;;  %v4266_v36 = vld [vmem:[#allocation2 + $0x870] ss:$8 sps:$4 sm:$0xff]  }
 0x114   :  { %2759 = vmatprep.subr.bf16.mxu1 %v4187_v37  ;;  %v544_v37 = vsub.s32 1, %v4787_v25 }
 0x116   :  { %2719 = vmatpush1.bf16.msra.mxu0 %v4182_v38  ;;  %v121_v38 = vld [vmem:[%s4850_s0 + $0x88] sm:$0xff] }
 0x117   :  { %2760 = vmatpush1.bf16.msra.mxu1 %v4185_v39  ;;  %2720 = vmatprep.subr.bf16.mxu0 %v4190_v40  ;;  %v140_v39 = vpack.c.bf16 %v116_v31, %v116_v31  ;;  %v142_v40 = vpack.c.bf16 %v118_v33, %v118_v33  ;;  %v4323_v31 = vld [vmem:[#allocation2 + $0x9e0] ss:$8 sps:$4 sm:$0xff]   ;;  %v4328_v33 = vld [vmem:[#allocation2 + $0x8d4] ss:$8 sps:$4 sm:$0xff]  }
 0x118   :  { %2761 = vmatprep.subr.bf16.mxu1 %v4193_v41  ;;  %v123_v41 = vld [vmem:[%s4850_s0 + $0x98] sm:$0xff] }
 0x11a   :  { %2721 = vmatpush1.bf16.msra.mxu0 %v4188_v42  ;;  %v541_v42 = vrot.slane %v536_v30, %v540_v32 }
 0x11b   :  { %2762 = vmatpush1.bf16.msra.mxu1 %v4191_v43  ;;  %2722 = vmatprep.subr.bf16.mxu0 %v4196_v44  ;;  %v4269_v43 = vld [vmem:[#allocation2 + $0x970] ss:$8 sps:$4 sm:$0xff]   ;;  %v4274_v44 = vld [vmem:[#allocation2 + $0x864] ss:$8 sps:$4 sm:$0xff]  }
 0x11c   :  { %2763 = vmatprep.subr.bf16.mxu1 %v4199_v45  ;;  %v4277_v45 = vld [vmem:[#allocation2 + $0x964] ss:$8 sps:$4 sm:$0xff]  }
 0x11e   :  { %2723 = vmatpush1.bf16.msra.mxu0 %v4194_v46  ;;  %v545_v46 = vrot.slane %v536_v30, %v544_v37  ;;  %v4320_v30 = vld [vmem:[#allocation2 + $0x8e0] ss:$8 sps:$4 sm:$0xff]  }
 0x11f   :  { %2764 = vmatpush1.bf16.msra.mxu1 %v4197_v47  ;;  %2724 = vmatprep.subr.bf16.mxu0 %v4202_v48  ;;  %v145_v47 = vpack.c.bf16 %v121_v38, %v121_v38  ;;  %v147_v48 = vpack.c.bf16 %v123_v41, %v123_v41  ;;  %v4334_v38 = vld [vmem:[#allocation2 + $0x8c4] ss:$8 sps:$4 sm:$0xff]   ;;  %v4335_v41 = vld [vmem:[#allocation2 + $0x9c0] ss:$8 sps:$4 sm:$0xff]  }
 0x120   :  { %2765 = vmatprep.subr.bf16.mxu1 %v4205_v49 }
 0x122   :  { %2725 = vmatpush1.bf16.msra.mxu0 %v4200_v50 }
 0x123   :  { %2766 = vmatpush1.bf16.msra.mxu1 %v4203_v51  ;;  %2726 = vmatprep.subr.bf16.mxu0 %v4208_v52  ;;  %v4272_v51 = vld [vmem:[#allocation2 + $0x860] ss:$8 sps:$4 sm:$0xff]  }
 0x124   :  { %2767 = vmatprep.subr.bf16.mxu1 %v4211_v53  ;;  %v4275_v53 = vld [vmem:[#allocation2 + $0x960] ss:$8 sps:$4 sm:$0xff]  }
 0x126   :  { %2727 = vmatpush1.bf16.msra.mxu0 %v4206_v54 }
 0x127   :  { %2768 = vmatpush1.bf16.msra.mxu1 %v4209_v55  ;;  %2728 = vmatprep.subr.bf16.mxu0 %v4214_v56  ;;  %v4280_v56 = vld [vmem:[#allocation2 + $0x854] ss:$8 sps:$4 sm:$0xff]  }
 0x128   :  { %2769 = vmatprep.subr.bf16.mxu1 %v4217_v57  ;;  %v4283_v57 = vld [vmem:[#allocation2 + $0x954] ss:$8 sps:$4 sm:$0xff]  }
 0x12a   :  { %2729 = vmatpush1.bf16.msra.mxu0 %v4212_v58 }
 0x12b   :  { %2770 = vmatpush1.bf16.msra.mxu1 %v4215_v59  ;;  %2730 = vmatprep.subr.bf16.mxu0 %v4220_v60 }
 0x12c   :  { %2771 = vmatprep.subr.bf16.mxu1 %v4223_v61 }
 0x12e   :  { %2731 = vmatpush2.bf16.msra.mxu0 %v4218_v62  ;;  %v4278_v62 = vld [vmem:[#allocation2 + $0x850] ss:$8 sps:$4 sm:$0xff]  }
 0x12f   :  { %2772 = vmatpush2.bf16.msra.mxu1 %v4221_v63  ;;  %2732 = vmatprep.subr.bf16.mxu0 %v4226_v0  ;;  %v4281_v63 = vld [vmem:[#allocation2 + $0x950] ss:$8 sps:$4 sm:$0xff]   ;;  %v4286_v0 = vld [vmem:[#allocation2 + $0x844] ss:$8 sps:$4 sm:$0xff]  }
 0x130   :  { %2773 = vmatprep.subr.bf16.mxu1 %v4229_v1 }
 0x132   :  { %2733 = vmatpush2.bf16.msra.mxu0 %v4224_v2  ;;  %v4289_v2 = vld [vmem:[#allocation2 + $0x944] ss:$8 sps:$4 sm:$0xff]  }
 0x133   :  { %2774 = vmatpush2.bf16.msra.mxu1 %v4227_v3  ;;  %2734 = vmatprep.subr.bf16.mxu0 %v4232_v4 }
 0x134   :  { %2775 = vmatprep.subr.bf16.mxu1 %v4235_v5  ;;  %v4284_v5 = vld [vmem:[#allocation2 + $0x840] ss:$8 sps:$4 sm:$0xff]  }
 0x136   :  { %2735 = vmatpush2.bf16.msra.mxu0 %v4230_v6  ;;  %v4287_v6 = vld [vmem:[#allocation2 + $0x940] ss:$8 sps:$4 sm:$0xff]  }
 0x137   :  { %2776 = vmatpush2.bf16.msra.mxu1 %v4233_v7  ;;  %2736 = vmatprep.subr.bf16.mxu0 %v4238_v8  ;;  %v4292_v7 = vld [vmem:[#allocation2 + $0x834] ss:$8 sps:$4 sm:$0xff]  }
 0x138   :  { %2777 = vmatprep.subr.bf16.mxu1 %v4241_v9  ;;  %v4295_v8 = vld [vmem:[#allocation2 + $0x934] ss:$8 sps:$4 sm:$0xff]   ;;  %v4290_v9 = vld [vmem:[#allocation2 + $0x830] ss:$8 sps:$4 sm:$0xff]  }
 0x13a   :  { %2737 = vmatpush2.bf16.msra.mxu0 %v4236_v10  ;;  %v4293_v10 = vld [vmem:[#allocation2 + $0x930] ss:$8 sps:$4 sm:$0xff]  }
 0x13b   :  { %2778 = vmatpush2.bf16.msra.mxu1 %v4239_v11  ;;  %2738 = vmatprep.subr.bf16.mxu0 %v4244_v12  ;;  %v4298_v11 = vld [vmem:[#allocation2 + $0x824] ss:$8 sps:$4 sm:$0xff]  }
 0x13c   :  { %2779 = vmatprep.subr.bf16.mxu1 %v4247_v13  ;;  %v4301_v12 = vld [vmem:[#allocation2 + $0x924] ss:$8 sps:$4 sm:$0xff]   ;;  %v4296_v13 = vld [vmem:[#allocation2 + $0x820] ss:$8 sps:$4 sm:$0xff]  }
 0x13e   :  { %2739 = vmatpush2.bf16.msra.mxu0 %v4242_v14  ;;  %v4299_v14 = vld [vmem:[#allocation2 + $0x920] ss:$8 sps:$4 sm:$0xff]  }
 0x13f   :  { %2780 = vmatpush2.bf16.msra.mxu1 %v4245_v15  ;;  %2740 = vmatprep.subr.bf16.mxu0 %v4250_v16  ;;  %v4304_v15 = vld [vmem:[#allocation2 + $0x814] ss:$8 sps:$4 sm:$0xff]  }
 0x140   :  { %2781 = vmatprep.subr.bf16.mxu1 %v4253_v17  ;;  %v4307_v16 = vld [vmem:[#allocation2 + $0x914] ss:$8 sps:$4 sm:$0xff]   ;;  %v4302_v17 = vld [vmem:[#allocation2 + $0x810] ss:$8 sps:$4 sm:$0xff]  }
 0x142   :  { %2741 = vmatpush2.bf16.msra.mxu0 %v4248_v18  ;;  %v4305_v18 = vld [vmem:[#allocation2 + $0x910] ss:$8 sps:$4 sm:$0xff]  }
 0x143   :  { %2782 = vmatpush2.bf16.msra.mxu1 %v4251_v19  ;;  %2742 = vmatprep.subr.bf16.mxu0 %v4256_v21  ;;  %v4310_v19 = vld [vmem:[#allocation2 + $0x804] ss:$8 sps:$4 sm:$0xff]   ;;  %v4308_v21 = vld [vmem:[#allocation2 + $0x800] ss:$8 sps:$4 sm:$0xff]  }
 0x144   :  { %2783 = vmatprep.subr.bf16.mxu1 %v4259_v22  ;;  %v4311_v22 = vld [vmem:[#allocation2 + $0x900] ss:$8 sps:$4 sm:$0xff]  }
 0x146   :  { %2743 = vmatpush2.bf16.msra.mxu0 %v4254_v23  ;;  %v4316_v23 = vld [vmem:[#allocation2 + $0x8f4] ss:$8 sps:$4 sm:$0xff]  }
 0x147   :  { %2784 = vmatpush2.bf16.msra.mxu1 %v4257_v24  ;;  %2744 = vmatprep.subr.bf16.mxu0 %v4262_v26  ;;  %v4319_v24 = vld [vmem:[#allocation2 + $0x9f4] ss:$8 sps:$4 sm:$0xff]   ;;  %v4314_v26 = vld [vmem:[#allocation2 + $0x8f0] ss:$8 sps:$4 sm:$0xff]  }
 0x148   :  { %2785 = vmatprep.subr.bf16.mxu1 %v4265_v27  ;;  %v4317_v27 = vld [vmem:[#allocation2 + $0x9f0] ss:$8 sps:$4 sm:$0xff]  }
 0x14a   :  { %2745 = vmatpush2.bf16.msra.mxu0 %v4260_v28  ;;  %v4322_v28 = vld [vmem:[#allocation2 + $0x8e4] ss:$8 sps:$4 sm:$0xff]  }
 0x14b   :  { %2786 = vmatpush2.bf16.msra.mxu1 %v4263_v29  ;;  %2796 = vmatprep.subr.bf16.mxu0 %v4268_v34  ;;  %v4325_v29 = vld [vmem:[#allocation2 + $0x9e4] ss:$8 sps:$4 sm:$0xff]   ;;  %v4331_v34 = vld [vmem:[#allocation2 + $0x9d4] ss:$8 sps:$4 sm:$0xff]  }
 0x14c   :  { %2837 = vmatprep.subr.bf16.mxu1 %v4271_v35  ;;  %v4326_v35 = vld [vmem:[#allocation2 + $0x8d0] ss:$8 sps:$4 sm:$0xff]  }
 0x14d   :  { %v2502_v49 = vpop.f32.mrf.mxu0  ;;  %2747 = vmatmul.mubr.bf16.vlgmr.msra.gmra.mxu0 %v140_v39  ;;  %v4337_v39 = vld [vmem:[#allocation2 + $0x9c4] ss:$8 sps:$4 sm:$0xff]  }
 0x14e   :  { %v2543_v50 = vpop.f32.mrf.mxu1  ;;  %2788 = vmatmul.mubr.bf16.vlgmr.msra.gmra.mxu1 %v142_v40  ;;  %v2503_v52 = vadd.f32 %v2502_v49, %v541_v42  ;;  %2797 = vmatpush1.bf16.msra.mxu0 %v4266_v36  ;;  %v4329_v36 = vld [vmem:[#allocation2 + $0x9d0] ss:$8 sps:$4 sm:$0xff]   ;;  %v4332_v40 = vld [vmem:[#allocation2 + $0x8c0] ss:$8 sps:$4 sm:$0xff]   ;;  %v4340_v42 = vld [vmem:[#allocation2 + $0x8b4] ss:$8 sps:$4 sm:$0xff]  }
 0x14f   :  { %2838 = vmatpush1.bf16.msra.mxu1 %v4269_v43  ;;  %v2504_v54 = vpop.f32.mrf.mxu0  ;;  %2798 = vmatprep.subr.bf16.mxu0 %v4274_v44  ;;  %v4343_v43 = vld [vmem:[#allocation2 + $0x9b4] ss:$8 sps:$4 sm:$0xff]   ;;  %v4338_v44 = vld [vmem:[#allocation2 + $0x8b0] ss:$8 sps:$4 sm:$0xff]   ;;  %v4347_v49 = vld [vmem:[#allocation2 + $0x9a0] ss:$8 sps:$4 sm:$0xff]  }
 0x150   :  { %v2545_v55 = vpop.f32.mrf.mxu1  ;;  %2839 = vmatprep.subr.bf16.mxu1 %v4277_v45  ;;  %v4807_v58 = vadd.f32 %v2543_v50, %v2503_v52  ;;  %v2505_v59 = vadd.f32 %v2504_v54, %v545_v46  ;;  %2828 = vmatprep.mubr.bf16.mxu0 %v145_v47  ;;  %v4341_v45 = vld [vmem:[#allocation2 + $0x9b0] ss:$8 sps:$4 sm:$0xff]   ;;  %v4346_v46 = vld [vmem:[#allocation2 + $0x8a4] ss:$8 sps:$4 sm:$0xff]   ;;  %v4352_v50 = vld [vmem:[#allocation2 + $0x894] ss:$8 sps:$4 sm:$0xff]  }
 0x151   :  { %2869 = vmatprep.mubr.bf16.mxu1 %v147_v48  ;;  %v2506_v60 = vpop.f32.mrf.mxu0  ;;  %v4349_v47 = vld [vmem:[#allocation2 + $0x9a4] ss:$8 sps:$4 sm:$0xff]   ;;  %v4344_v48 = vld [vmem:[#allocation2 + $0x8a0] ss:$8 sps:$4 sm:$0xff]   ;;  %v4350_v52 = vld [vmem:[#allocation2 + $0x890] ss:$8 sps:$4 sm:$0xff]  }
 0x152   :  { %v2547_v61 = vpop.f32.mrf.mxu1  ;;  %v4809_v1 = vadd.f32 %v2545_v55, %v2505_v59  ;;  %2799 = vmatpush1.bf16.msra.mxu0 %v4272_v51  ;;  %v4355_v51 = vld [vmem:[#allocation2 + $0x994] ss:$8 sps:$4 sm:$0xff]   ;;  %v4358_v54 = vld [vmem:[#allocation2 + $0x884] ss:$8 sps:$4 sm:$0xff]  }
 0x153   :  { %2840 = vmatpush1.bf16.msra.mxu1 %v4275_v53  ;;  %v2507_v3 = vpop.f32.mrf.mxu0  ;;  %2800 = vmatprep.subr.bf16.mxu0 %v4280_v56  ;;  %v4353_v53 = vld [vmem:[#allocation2 + $0x990] ss:$8 sps:$4 sm:$0xff]   ;;  %v4361_v55 = vld [vmem:[#allocation2 + $0x984] ss:$8 sps:$4 sm:$0xff]   ;;  %v4356_v56 = vld [vmem:[#allocation2 + $0x880] ss:$8 sps:$4 sm:$0xff]  }
 0x154   :  { %v2548_v4 = vpop.f32.mrf.mxu1  ;;  %2841 = vmatprep.subr.bf16.mxu1 %v4283_v57  ;;  %v4359_v57 = vld [vmem:[#allocation2 + $0x980] ss:$8 sps:$4 sm:$0xff]   ;;  %v122_v60 = vld [vmem:[%s4850_s0 + $0x90] sm:$0xff]  ;;  %v127_v3 = vld [vmem:[%s4850_s0 + $0xb8] sm:$0xff] }
 0x155   :  { %v120_v59 = vld [vmem:[%s4850_s0 + $0x80] sm:$0xff]  ;;  %v4364_v61 = vld [vmem:[#allocation2 + $0xa74] ss:$8 sps:$4 sm:$0xff]   ;;  %v4362_v4 = vld [vmem:[#allocation2 + $0xa70] ss:$8 sps:$4 sm:$0xff]  }
 0x156   :  { %2801 = vmatpush1.bf16.msra.mxu0 %v4278_v62  ;;  %v4367_v62 = vld [vmem:[#allocation2 + $0xb74] ss:$8 sps:$4 sm:$0xff]  }
 0x157   :  { %2842 = vmatpush1.bf16.msra.mxu1 %v4281_v63  ;;  %2802 = vmatprep.subr.bf16.mxu0 %v4286_v0  ;;  %v144_v63 = vpack.c.bf16 %v120_v59, %v120_v59  ;;  %v146_v0 = vpack.c.bf16 %v122_v60, %v122_v60  ;;  %v4427_v59 = vld [vmem:[#allocation2 + $0xbd4] ss:$8 sps:$4 sm:$0xff]   ;;  %v4422_v60 = vld [vmem:[#allocation2 + $0xad0] ss:$8 sps:$4 sm:$0xff]  }
 0x158   :  { %2843 = vmatprep.subr.bf16.mxu1 %v4289_v2  ;;  %v125_v2 = vld [vmem:[%s4850_s0 + $0xa8] sm:$0xff] }
 0x15a   :  { %2803 = vmatpush1.bf16.msra.mxu0 %v4284_v5  ;;  %v4365_v5 = vld [vmem:[#allocation2 + $0xb70] ss:$8 sps:$4 sm:$0xff]  }
 0x15b   :  { %2844 = vmatpush1.bf16.msra.mxu1 %v4287_v6  ;;  %2804 = vmatprep.subr.bf16.mxu0 %v4292_v7  ;;  %v4370_v6 = vld [vmem:[#allocation2 + $0xa64] ss:$8 sps:$4 sm:$0xff]  }
 0x15c   :  { %2845 = vmatprep.subr.bf16.mxu1 %v4295_v8  ;;  %v4373_v7 = vld [vmem:[#allocation2 + $0xb64] ss:$8 sps:$4 sm:$0xff]   ;;  %v149_v8 = vpack.c.bf16 %v125_v2, %v125_v2  ;;  %v4431_v2 = vld [vmem:[#allocation2 + $0xbc0] ss:$8 sps:$4 sm:$0xff]  }
 0x15e   :  { %2805 = vmatpush1.bf16.msra.mxu0 %v4290_v9  ;;  %v151_v9 = vpack.c.bf16 %v127_v3, %v127_v3  ;;  %v4436_v3 = vld [vmem:[#allocation2 + $0xab4] ss:$8 sps:$4 sm:$0xff]  }
 0x15f   :  { %2846 = vmatpush1.bf16.msra.mxu1 %v4293_v10  ;;  %2806 = vmatprep.subr.bf16.mxu0 %v4298_v11 }
 0x160   :  { %2847 = vmatprep.subr.bf16.mxu1 %v4301_v12 }
 0x162   :  { %2807 = vmatpush1.bf16.msra.mxu0 %v4296_v13  ;;  %v4368_v13 = vld [vmem:[#allocation2 + $0xa60] ss:$8 sps:$4 sm:$0xff]  }
 0x163   :  { %2848 = vmatpush1.bf16.msra.mxu1 %v4299_v14  ;;  %2808 = vmatprep.subr.bf16.mxu0 %v4304_v15  ;;  %v4371_v14 = vld [vmem:[#allocation2 + $0xb60] ss:$8 sps:$4 sm:$0xff]  }
 0x164   :  { %2849 = vmatprep.subr.bf16.mxu1 %v4307_v16 }
 0x166   :  { %2809 = vmatpush1.bf16.msra.mxu0 %v4302_v17  ;;  %v4376_v17 = vld [vmem:[#allocation2 + $0xa54] ss:$8 sps:$4 sm:$0xff]  }
 0x167   :  { %2850 = vmatpush1.bf16.msra.mxu1 %v4305_v18  ;;  %2810 = vmatprep.subr.bf16.mxu0 %v4310_v19  ;;  %v4379_v18 = vld [vmem:[#allocation2 + $0xb54] ss:$8 sps:$4 sm:$0xff]  }
 0x168   :  { %2851 = vmatprep.subr.bf16.mxu1 %v4313_v20 }
 0x16a   :  { %2811 = vmatpush1.bf16.msra.mxu0 %v4308_v21 }
 0x16b   :  { %2852 = vmatpush1.bf16.msra.mxu1 %v4311_v22  ;;  %2812 = vmatprep.subr.bf16.mxu0 %v4316_v23 }
 0x16c   :  { %2853 = vmatprep.subr.bf16.mxu1 %v4319_v24  ;;  %v4377_v24 = vld [vmem:[#allocation2 + $0xb50] ss:$8 sps:$4 sm:$0xff]  }
 0x16e   :  { %2813 = vmatpush2.bf16.msra.mxu0 %v4314_v26 }
 0x16f   :  { %2854 = vmatpush2.bf16.msra.mxu1 %v4317_v27  ;;  %2814 = vmatprep.subr.bf16.mxu0 %v4322_v28  ;;  %v4382_v28 = vld [vmem:[#allocation2 + $0xa44] ss:$8 sps:$4 sm:$0xff]  }
 0x170   :  { %2855 = vmatprep.subr.bf16.mxu1 %v4325_v29  ;;  %v4385_v29 = vld [vmem:[#allocation2 + $0xb44] ss:$8 sps:$4 sm:$0xff]  }
 0x172   :  { %2815 = vmatpush2.bf16.msra.mxu0 %v4320_v30  ;;  %v4380_v30 = vld [vmem:[#allocation2 + $0xa40] ss:$8 sps:$4 sm:$0xff]  }
 0x173   :  { %2856 = vmatpush2.bf16.msra.mxu1 %v4323_v31  ;;  %2816 = vmatprep.subr.bf16.mxu0 %v4328_v33  ;;  %v4388_v31 = vld [vmem:[#allocation2 + $0xa34] ss:$8 sps:$4 sm:$0xff]  }
 0x174   :  { %2857 = vmatprep.subr.bf16.mxu1 %v4331_v34  ;;  %v4391_v33 = vld [vmem:[#allocation2 + $0xb34] ss:$8 sps:$4 sm:$0xff]   ;;  %v4386_v34 = vld [vmem:[#allocation2 + $0xa30] ss:$8 sps:$4 sm:$0xff]  }
 0x176   :  { %2817 = vmatpush2.bf16.msra.mxu0 %v4326_v35  ;;  %v4389_v35 = vld [vmem:[#allocation2 + $0xb30] ss:$8 sps:$4 sm:$0xff]  }
 0x177   :  { %2858 = vmatpush2.bf16.msra.mxu1 %v4329_v36  ;;  %2818 = vmatprep.subr.bf16.mxu0 %v4334_v38  ;;  %v4394_v36 = vld [vmem:[#allocation2 + $0xa24] ss:$8 sps:$4 sm:$0xff]  }
 0x178   :  { %2859 = vmatprep.subr.bf16.mxu1 %v4337_v39  ;;  %v4397_v38 = vld [vmem:[#allocation2 + $0xb24] ss:$8 sps:$4 sm:$0xff]   ;;  %v4392_v39 = vld [vmem:[#allocation2 + $0xa20] ss:$8 sps:$4 sm:$0xff]  }
 0x17a   :  { %2819 = vmatpush2.bf16.msra.mxu0 %v4332_v40  ;;  %v4395_v40 = vld [vmem:[#allocation2 + $0xb20] ss:$8 sps:$4 sm:$0xff]  }
 0x17b   :  { %2860 = vmatpush2.bf16.msra.mxu1 %v4335_v41  ;;  %2820 = vmatprep.subr.bf16.mxu0 %v4340_v42  ;;  %v4400_v41 = vld [vmem:[#allocation2 + $0xa14] ss:$8 sps:$4 sm:$0xff]  }
 0x17c   :  { %2861 = vmatprep.subr.bf16.mxu1 %v4343_v43  ;;  %v4403_v42 = vld [vmem:[#allocation2 + $0xb14] ss:$8 sps:$4 sm:$0xff]   ;;  %v4398_v43 = vld [vmem:[#allocation2 + $0xa10] ss:$8 sps:$4 sm:$0xff]  }
 0x17e   :  { %2821 = vmatpush2.bf16.msra.mxu0 %v4338_v44  ;;  %v4401_v44 = vld [vmem:[#allocation2 + $0xb10] ss:$8 sps:$4 sm:$0xff]  }
 0x17f   :  { %2862 = vmatpush2.bf16.msra.mxu1 %v4341_v45  ;;  %2822 = vmatprep.subr.bf16.mxu0 %v4346_v46  ;;  %v4406_v45 = vld [vmem:[#allocation2 + $0xa04] ss:$8 sps:$4 sm:$0xff]  }
 0x180   :  { %2863 = vmatprep.subr.bf16.mxu1 %v4349_v47  ;;  %v4409_v46 = vld [vmem:[#allocation2 + $0xb04] ss:$8 sps:$4 sm:$0xff]   ;;  %v4404_v47 = vld [vmem:[#allocation2 + $0xa00] ss:$8 sps:$4 sm:$0xff]  }
 0x182   :  { %2823 = vmatpush2.bf16.msra.mxu0 %v4344_v48  ;;  %v4407_v48 = vld [vmem:[#allocation2 + $0xb00] ss:$8 sps:$4 sm:$0xff]  }
 0x183   :  { %2864 = vmatpush2.bf16.msra.mxu1 %v4347_v49  ;;  %2824 = vmatprep.subr.bf16.mxu0 %v4352_v50  ;;  %v4412_v49 = vld [vmem:[#allocation2 + $0xaf4] ss:$8 sps:$4 sm:$0xff]  }
 0x184   :  { %2865 = vmatprep.subr.bf16.mxu1 %v4355_v51  ;;  %v4415_v50 = vld [vmem:[#allocation2 + $0xbf4] ss:$8 sps:$4 sm:$0xff]   ;;  %v4410_v51 = vld [vmem:[#allocation2 + $0xaf0] ss:$8 sps:$4 sm:$0xff]  }
 0x186   :  { %2825 = vmatpush2.bf16.msra.mxu0 %v4350_v52  ;;  %v4413_v52 = vld [vmem:[#allocation2 + $0xbf0] ss:$8 sps:$4 sm:$0xff]  }
 0x187   :  { %2866 = vmatpush2.bf16.msra.mxu1 %v4353_v53  ;;  %2826 = vmatprep.subr.bf16.mxu0 %v4358_v54  ;;  %v4418_v53 = vld [vmem:[#allocation2 + $0xae4] ss:$8 sps:$4 sm:$0xff]  }
 0x188   :  { %2867 = vmatprep.subr.bf16.mxu1 %v4361_v55  ;;  %v4421_v54 = vld [vmem:[#allocation2 + $0xbe4] ss:$8 sps:$4 sm:$0xff]   ;;  %v4416_v55 = vld [vmem:[#allocation2 + $0xae0] ss:$8 sps:$4 sm:$0xff]  }
 0x18a   :  { %2827 = vmatpush2.bf16.msra.mxu0 %v4356_v56  ;;  %v4419_v56 = vld [vmem:[#allocation2 + $0xbe0] ss:$8 sps:$4 sm:$0xff]  }
 0x18b   :  { %2868 = vmatpush2.bf16.msra.mxu1 %v4359_v57  ;;  %2878 = vmatprep.subr.bf16.mxu0 %v4364_v61  ;;  %v4424_v57 = vld [vmem:[#allocation2 + $0xad4] ss:$8 sps:$4 sm:$0xff]   ;;  %v4425_v61 = vld [vmem:[#allocation2 + $0xbd0] ss:$8 sps:$4 sm:$0xff]  }
 0x18c   :  { %2919 = vmatprep.subr.bf16.mxu1 %v4367_v62  ;;  %v4430_v62 = vld [vmem:[#allocation2 + $0xac4] ss:$8 sps:$4 sm:$0xff]  }
 0x18d   :  { %v2584_v10 = vpop.f32.mrf.mxu0  ;;  %2829 = vmatmul.mubr.bf16.vlgmr.msra.gmra.mxu0 %v144_v63  ;;  %v4433_v63 = vld [vmem:[#allocation2 + $0xbc4] ss:$8 sps:$4 sm:$0xff]  }
 0x18e   :  { %v2625_v11 = vpop.f32.mrf.mxu1  ;;  %2870 = vmatmul.mubr.bf16.vlgmr.msra.gmra.mxu1 %v146_v0  ;;  %v2585_v12 = vadd.f32 %v2584_v10, %v4807_v58  ;;  %2879 = vmatpush1.bf16.msra.mxu0 %v4362_v4  ;;  %v4374_v58 = vld [vmem:[#allocation2 + $0xa50] ss:$8 sps:$4 sm:$0xff]   ;;  %v4428_v0 = vld [vmem:[#allocation2 + $0xac0] ss:$8 sps:$4 sm:$0xff]   ;;  %v4439_v4 = vld [vmem:[#allocation2 + $0xbb4] ss:$8 sps:$4 sm:$0xff]  }
 0x18f   :  { %2920 = vmatpush1.bf16.msra.mxu1 %v4365_v5  ;;  %v2586_v15 = vpop.f32.mrf.mxu0  ;;  %2880 = vmatprep.subr.bf16.mxu0 %v4370_v6  ;;  %v4434_v5 = vld [vmem:[#allocation2 + $0xab0] ss:$8 sps:$4 sm:$0xff]   ;;  %v4443_v10 = vld [vmem:[#allocation2 + $0xba0] ss:$8 sps:$4 sm:$0xff]  }
 0x190   :  { %v2627_v16 = vpop.f32.mrf.mxu1  ;;  %2921 = vmatprep.subr.bf16.mxu1 %v4373_v7  ;;  %v4824_v19 = vadd.f32 %v2625_v11, %v2585_v12  ;;  %v2587_v20 = vadd.f32 %v2586_v15, %v4809_v1  ;;  %2910 = vmatprep.mubr.bf16.mxu0 %v149_v8  ;;  %v4383_v1 = vld [vmem:[#allocation2 + $0xb40] ss:$8 sps:$4 sm:$0xff]   ;;  %v4437_v6 = vld [vmem:[#allocation2 + $0xbb0] ss:$8 sps:$4 sm:$0xff]   ;;  %v4442_v7 = vld [vmem:[#allocation2 + $0xaa4] ss:$8 sps:$4 sm:$0xff]  }
 0x191   :  { %2951 = vmatprep.mubr.bf16.mxu1 %v151_v9  ;;  %v2588_v21 = vpop.f32.mrf.mxu0  ;;  %v4445_v8 = vld [vmem:[#allocation2 + $0xba4] ss:$8 sps:$4 sm:$0xff]   ;;  %v4440_v9 = vld [vmem:[#allocation2 + $0xaa0] ss:$8 sps:$4 sm:$0xff]   ;;  %v4448_v11 = vld [vmem:[#allocation2 + $0xa94] ss:$8 sps:$4 sm:$0xff]  }
 0x192   :  { %v2629_v22 = vpop.f32.mrf.mxu1  ;;  %v4827_v23 = vadd.f32 %v2627_v16, %v2587_v20  ;;  %2881 = vmatpush1.bf16.msra.mxu0 %v4368_v13  ;;  %v4451_v12 = vld [vmem:[#allocation2 + $0xb94] ss:$8 sps:$4 sm:$0xff]   ;;  %v4446_v13 = vld [vmem:[#allocation2 + $0xa90] ss:$8 sps:$4 sm:$0xff]   ;;  %v4454_v15 = vld [vmem:[#allocation2 + $0xa84] ss:$8 sps:$4 sm:$0xff]  }
 0x193   :  { %2922 = vmatpush1.bf16.msra.mxu1 %v4371_v14  ;;  %v2589_v26 = vpop.f32.mrf.mxu0  ;;  %2882 = vmatprep.subr.bf16.mxu0 %v4376_v17  ;;  %v4449_v14 = vld [vmem:[#allocation2 + $0xb90] ss:$8 sps:$4 sm:$0xff]   ;;  %v4457_v16 = vld [vmem:[#allocation2 + $0xb84] ss:$8 sps:$4 sm:$0xff]   ;;  %v4452_v17 = vld [vmem:[#allocation2 + $0xa80] ss:$8 sps:$4 sm:$0xff]  }
 0x194   :  { %v2630_v27 = vpop.f32.mrf.mxu1  ;;  %2923 = vmatprep.subr.bf16.mxu1 %v4379_v18  ;;  %v4455_v18 = vld [vmem:[#allocation2 + $0xb80] ss:$8 sps:$4 sm:$0xff]   ;;  %v126_v21 = vld [vmem:[%s4850_s0 + $0xb0] sm:$0xff] }
 0x195   :  { %v124_v20 = vld [vmem:[%s4850_s0 + $0xa0] sm:$0xff]  ;;  %s4686_s0 = smov [#allocation13]  }
 0x196   :  { %2883 = vmatpush1.bf16.msra.mxu0 %v4374_v58  ;;  %v148_v22 = vpack.c.bf16 %v124_v20, %v124_v20  ;;  %v150_v58 = vpack.c.bf16 %v126_v21, %v126_v21  ;;  %v4507_v20 = vld [vmem:[#allocation10 + $0x38] sm:$0xff]   ;;  %v4508_v21 = vld [vmem:[#allocation10 + $0x70] sm:$0xff]   ;;  %s3404_s1 = sshll.u32 %s4686_s0, 4  ;;  %s3405_s1 = int_to_ptr.vmem [resolvable:$true] %s3404_s1 }
 0x197   :  { %2924 = vmatpush1.bf16.msra.mxu1 %v4377_v24  ;;  %2884 = vmatprep.subr.bf16.mxu0 %v4382_v28  ;;  %s4646_s24 = scalar_lea.vmem %s3405_s1, 128  ;;  %p4651_p3 = scmp.lt.s32.totalorder %s3405_s1, %s3405_s1 }
 0x198   :  { %2925 = vmatprep.subr.bf16.mxu1 %v4385_v29  ;;  %p4647_p2 = scmp.ne.s32.totalorder %s3405_s1, %s4646_s24  ;;  %p4652_p4 = scmp.lt.s32.totalorder %s4646_s24, %s4646_s24 }
 0x19a   :  { %2885 = vmatpush1.bf16.msra.mxu0 %v4380_v30  ;;  %p4653_p5 = por %p4652_p4, %p4651_p3 }
 0x19b   :  { %2926 = vmatpush1.bf16.msra.mxu1 %v4383_v1  ;;  %2886 = vmatprep.subr.bf16.mxu0 %v4388_v31 }
 0x19c   :  { %2927 = vmatprep.subr.bf16.mxu1 %v4391_v33  ;;  %p4654_p6 = pnand %p4653_p5, %p4647_p2 }
 0x19e   :  { %2887 = vmatpush1.bf16.msra.mxu0 %v4386_v34 }
 0x19f   :  { %2928 = vmatpush1.bf16.msra.mxu1 %v4389_v35  ;;  %2888 = vmatprep.subr.bf16.mxu0 %v4394_v36 }
 0x1a0   :  { %2929 = vmatprep.subr.bf16.mxu1 %v4397_v38  ;;  %v4458_v38 = vld [vmem:[#allocation7 + $0x70] ss:$8 sps:$4 sm:$0xff]  }
 0x1a2   :  { %2889 = vmatpush1.bf16.msra.mxu0 %v4392_v39  ;;  %v4460_v39 = vld [vmem:[#allocation7 + $0x74] ss:$8 sps:$4 sm:$0xff]  }
 0x1a3   :  { %2930 = vmatpush1.bf16.msra.mxu1 %v4395_v40  ;;  %2890 = vmatprep.subr.bf16.mxu0 %v4400_v41  ;;  %v4463_v40 = vld [vmem:[#allocation7 + $0x64] ss:$8 sps:$4 sm:$0xff]   ;;  %v4461_v41 = vld [vmem:[#allocation7 + $0x60] ss:$8 sps:$4 sm:$0xff]  }
 0x1a4   :  { %2931 = vmatprep.subr.bf16.mxu1 %v4403_v42  ;;  %v4464_v42 = vld [vmem:[#allocation7 + $0x50] ss:$8 sps:$4 sm:$0xff]  }
 0x1a6   :  { %2891 = vmatpush1.bf16.msra.mxu0 %v4398_v43  ;;  %v4469_v43 = vld [vmem:[#allocation7 + $0x44] ss:$8 sps:$4 sm:$0xff]  }
 0x1a7   :  { %2932 = vmatpush1.bf16.msra.mxu1 %v4401_v44  ;;  %2892 = vmatprep.subr.bf16.mxu0 %v4406_v45  ;;  %v4472_v44 = vld [vmem:[#allocation7 + $0x34] ss:$8 sps:$4 sm:$0xff]   ;;  %v4470_v45 = vld [vmem:[#allocation7 + $0x30] ss:$8 sps:$4 sm:$0xff]  }
 0x1a8   :  { %2933 = vmatprep.subr.bf16.mxu1 %v4409_v46  ;;  %v4475_v46 = vld [vmem:[#allocation7 + $0x24] ss:$8 sps:$4 sm:$0xff]  }
 0x1aa   :  { %2893 = vmatpush1.bf16.msra.mxu0 %v4404_v47  ;;  %v4473_v47 = vld [vmem:[#allocation7 + $0x20] ss:$8 sps:$4 sm:$0xff]  }
 0x1ab   :  { %2934 = vmatpush1.bf16.msra.mxu1 %v4407_v48  ;;  %2894 = vmatprep.subr.bf16.mxu0 %v4412_v49  ;;  %v4478_v48 = vld [vmem:[#allocation7 + $0x14] ss:$8 sps:$4 sm:$0xff]   ;;  %v4476_v49 = vld [vmem:[#allocation7 + $0x10] ss:$8 sps:$4 sm:$0xff]  }
 0x1ac   :  { %2935 = vmatprep.subr.bf16.mxu1 %v4415_v50  ;;  %v4481_v50 = vld [vmem:[#allocation7 + $0x4] ss:$8 sps:$4 sm:$0xff]  }
 0x1ae   :  { %2895 = vmatpush2.bf16.msra.mxu0 %v4410_v51  ;;  %v4479_v51 = vld [vmem:[#allocation7] ss:$8 sps:$4 sm:$0xff]  }
 0x1af   :  { %2936 = vmatpush2.bf16.msra.mxu1 %v4413_v52  ;;  %2896 = vmatprep.subr.bf16.mxu0 %v4418_v53  ;;  %v4484_v52 = vld [vmem:[#allocation7 + $0xf4] ss:$8 sps:$4 sm:$0xff]   ;;  %v4482_v53 = vld [vmem:[#allocation7 + $0xf0] ss:$8 sps:$4 sm:$0xff]  }
 0x1b0   :  { %2937 = vmatprep.subr.bf16.mxu1 %v4421_v54  ;;  %v4487_v54 = vld [vmem:[#allocation7 + $0xe4] ss:$8 sps:$4 sm:$0xff]  }
 0x1b2   :  { %2897 = vmatpush2.bf16.msra.mxu0 %v4416_v55  ;;  %v4485_v55 = vld [vmem:[#allocation7 + $0xe0] ss:$8 sps:$4 sm:$0xff]  }
 0x1b3   :  { %2938 = vmatpush2.bf16.msra.mxu1 %v4419_v56  ;;  %2898 = vmatprep.subr.bf16.mxu0 %v4424_v57  ;;  %v4490_v56 = vld [vmem:[#allocation7 + $0xd4] ss:$8 sps:$4 sm:$0xff]   ;;  %v4488_v57 = vld [vmem:[#allocation7 + $0xd0] ss:$8 sps:$4 sm:$0xff]  }
 0x1b4   :  { %2939 = vmatprep.subr.bf16.mxu1 %v4427_v59  ;;  %v4493_v59 = vld [vmem:[#allocation7 + $0xc4] ss:$8 sps:$4 sm:$0xff]  }
 0x1b6   :  { %2899 = vmatpush2.bf16.msra.mxu0 %v4422_v60  ;;  %v4491_v60 = vld [vmem:[#allocation7 + $0xc0] ss:$8 sps:$4 sm:$0xff]  }
 0x1b7   :  { %2940 = vmatpush2.bf16.msra.mxu1 %v4425_v61  ;;  %2900 = vmatprep.subr.bf16.mxu0 %v4430_v62  ;;  %v4496_v61 = vld [vmem:[#allocation7 + $0xb4] ss:$8 sps:$4 sm:$0xff]   ;;  %v4494_v62 = vld [vmem:[#allocation7 + $0xb0] ss:$8 sps:$4 sm:$0xff]  }
 0x1b8   :  { %2941 = vmatprep.subr.bf16.mxu1 %v4433_v63  ;;  %v4499_v63 = vld [vmem:[#allocation7 + $0xa4] ss:$8 sps:$4 sm:$0xff]  }
 0x1ba   :  { %2901 = vmatpush2.bf16.msra.mxu0 %v4428_v0  ;;  %v4497_v0 = vld [vmem:[#allocation7 + $0xa0] ss:$8 sps:$4 sm:$0xff]  }
 0x1bb   :  { %2942 = vmatpush2.bf16.msra.mxu1 %v4431_v2  ;;  %2902 = vmatprep.subr.bf16.mxu0 %v4436_v3 }
 0x1bc   :  { %2943 = vmatprep.subr.bf16.mxu1 %v4439_v4 }
 0x1be   :  { %2903 = vmatpush2.bf16.msra.mxu0 %v4434_v5 }
 0x1bf   :  { %2944 = vmatpush2.bf16.msra.mxu1 %v4437_v6  ;;  %2904 = vmatprep.subr.bf16.mxu0 %v4442_v7  ;;  %v4502_v7 = vld [vmem:[#allocation7 + $0x94] ss:$8 sps:$4 sm:$0xff]  }
 0x1c0   :  { %2945 = vmatprep.subr.bf16.mxu1 %v4445_v8 }
 0x1c2   :  { %2905 = vmatpush2.bf16.msra.mxu0 %v4440_v9 }
 0x1c3   :  { %2946 = vmatpush2.bf16.msra.mxu1 %v4443_v10  ;;  %2906 = vmatprep.subr.bf16.mxu0 %v4448_v11  ;;  %v4500_v10 = vld [vmem:[#allocation7 + $0x90] ss:$8 sps:$4 sm:$0xff]  }
 0x1c4   :  { %2947 = vmatprep.subr.bf16.mxu1 %v4451_v12 }
 0x1c6   :  { %2907 = vmatpush2.bf16.msra.mxu0 %v4446_v13 }
 0x1c7   :  { %2948 = vmatpush2.bf16.msra.mxu1 %v4449_v14  ;;  %2908 = vmatprep.subr.bf16.mxu0 %v4454_v15 }
 0x1c8   :  { %2949 = vmatprep.subr.bf16.mxu1 %v4457_v16  ;;  %v4505_v16 = vld [vmem:[#allocation7 + $0x84] ss:$8 sps:$4 sm:$0xff]  }
 0x1ca   :  { %2909 = vmatpush2.bf16.msra.mxu0 %v4452_v17  ;;  %v4503_v17 = vld [vmem:[#allocation7 + $0x80] ss:$8 sps:$4 sm:$0xff]  }
 0x1cb   :  { %2950 = vmatpush2.bf16.msra.mxu1 %v4455_v18  ;;  %3168 = vmatprep.subr.bf16.mxu0 %v4460_v39  ;;  %v4506_v18 = vld [vmem:[#allocation10 + $0x78] sm:$0xff]  }
 0x1cc   :  { %3849 = vmatprep.subr.bf16.mxu1 %v4506_v18 }
 0x1cd   :  { %v2666_v24 = vpop.f32.mrf.mxu0  ;;  %2911 = vmatmul.mubr.bf16.vlgmr.msra.gmra.mxu0 %v148_v22  ;;  %v4509_v22 = vld [vmem:[#allocation10 + $0x30] sm:$0xff]  }
 0x1ce   :  { %v2707_v26 = vpop.f32.mrf.mxu1  ;;  %2952 = vmatmul.mubr.bf16.vlgmr.msra.gmra.mxu1 %v150_v58  ;;  %v2667_v27 = vadd.f32 %v2666_v24, %v4824_v19  ;;  %3169 = vmatpush1.bf16.msra.mxu0 %v4458_v38  ;;  %v4466_v19 = vld [vmem:[#allocation7 + $0x54] ss:$8 sps:$4 sm:$0xff]   ;;  %v4510_v58 = vld [vmem:[#allocation10 + $0x68] sm:$0xff]  }
 0x1cf   :  { %v2668_v28 = vpop.f32.mrf.mxu0  ;;  %3170 = vmatprep.subr.bf16.mxu0 %v4463_v40  ;;  %3850 = vmatpush3.bf16.msra.mxu1 %v4507_v20  ;;  %v4511_v24 = vld [vmem:[#allocation10 + $0x28] sm:$0xff]  }
 0x1d0   :  { %v2709_v29 = vpop.f32.mrf.mxu1  ;;  %v4836_v30 = vadd.f32 %v2707_v26, %v2667_v27  ;;  %v2669_v1 = vadd.f32 %v2668_v28, %v4827_v23  ;;  %v4467_v23 = vld [vmem:[#allocation7 + $0x40] ss:$8 sps:$4 sm:$0xff]   ;;  %3851 = vmatprep.subr.bf16.mxu1 %v4508_v21 }
 0x1d1   :  { %v2670_v31 = vpop.f32.mrf.mxu0  ;;  %v4512_v26 = vld [vmem:[#allocation10 + $0x60] sm:$0xff]   ;;  %v4514_v28 = vld [vmem:[#allocation10 + $0x58] sm:$0xff]  }
 0x1d2   :  { %v2711_v33 = vpop.f32.mrf.mxu1  ;;  %v4839_v34 = vadd.f32 %v2709_v29, %v2669_v1  ;;  %3171 = vmatpush1.bf16.msra.mxu0 %v4461_v41  ;;  %v4513_v27 = vld [vmem:[#allocation10 + $0x20] sm:$0xff]   ;;  %v4515_v29 = vld [vmem:[#allocation10 + $0x18] sm:$0xff]   ;;  %v4517_v1 = vld [vmem:[#allocation10 + $0x10] sm:$0xff]  }
 0x1d3   :  { %v2671_v35 = vpop.f32.mrf.mxu0  ;;  %3172 = vmatprep.subr.bf16.mxu0 %v4466_v19  ;;  %3852 = vmatpush3.bf16.msra.mxu1 %v4509_v22 }
 0x1d4   :  { %v2712_v36 = vpop.f32.mrf.mxu1  ;;  %3853 = vmatprep.subr.bf16.mxu1 %v4510_v58 }
 0x1d6   :  { %3173 = vmatpush1.bf16.msra.mxu0 %v4464_v42 }
 0x1d7   :  { %3174 = vmatprep.subr.bf16.mxu0 %v4469_v43  ;;  %3854 = vmatpush3.bf16.msra.mxu1 %v4511_v24 }
 0x1d8   :  { %3855 = vmatprep.subr.bf16.mxu1 %v4512_v26 }
 0x1da   :  { %3175 = vmatpush1.bf16.msra.mxu0 %v4467_v23 }
 0x1db   :  { %3176 = vmatprep.subr.bf16.mxu0 %v4472_v44  ;;  %3856 = vmatpush3.bf16.msra.mxu1 %v4513_v27 }
 0x1dc   :  { %3857 = vmatprep.subr.bf16.mxu1 %v4514_v28 }
 0x1de   :  { %3177 = vmatpush1.bf16.msra.mxu0 %v4470_v45 }
 0x1df   :  { %3178 = vmatprep.subr.bf16.mxu0 %v4475_v46  ;;  %3858 = vmatpush3.bf16.msra.mxu1 %v4515_v29 }
 0x1e2   :  { %3179 = vmatpush1.bf16.msra.mxu0 %v4473_v47 }
 0x1e3   :  { %3180 = vmatprep.subr.bf16.mxu0 %v4478_v48 }
 0x1e6   :  { %3181 = vmatpush1.bf16.msra.mxu0 %v4476_v49 }
 0x1e7   :  { %3182 = vmatprep.subr.bf16.mxu0 %v4481_v50 }
 0x1ea   :  { %3183 = vmatpush1.bf16.msra.mxu0 %v4479_v51 }
 0x1eb   :  { %3184 = vmatprep.subr.bf16.mxu0 %v4484_v52 }
 0x1ee   :  { %3185 = vmatpush2.bf16.msra.mxu0 %v4482_v53 }
 0x1ef   :  { %3186 = vmatprep.subr.bf16.mxu0 %v4487_v54 }
 0x1f2   :  { %3187 = vmatpush2.bf16.msra.mxu0 %v4485_v55 }
 0x1f3   :  { %3188 = vmatprep.subr.bf16.mxu0 %v4490_v56 }
 0x1f6   :  { %3189 = vmatpush2.bf16.msra.mxu0 %v4488_v57 }
 0x1f7   :  { %3190 = vmatprep.subr.bf16.mxu0 %v4493_v59 }
 0x1fa   :  { %3191 = vmatpush2.bf16.msra.mxu0 %v4491_v60  ;;  %v4518_v60 = vld [vmem:[#allocation10 + $0x48] sm:$0xff]  }
 0x1fb   :  { %3192 = vmatprep.subr.bf16.mxu0 %v4496_v61  ;;  %v4519_v61 = vld [vmem:[#allocation10 + $0x8] sm:$0xff]  }
 0x1fe   :  { %3193 = vmatpush2.bf16.msra.mxu0 %v4494_v62  ;;  %v4520_v62 = vld [vmem:[#allocation10 + $0x40] sm:$0xff]  }
 0x1ff   :  { %3194 = vmatprep.subr.bf16.mxu0 %v4499_v63  ;;  %v4521_v63 = vld [vmem:[#allocation10] sm:$0xff]  }
 0x202   :  { %3195 = vmatpush2.bf16.msra.mxu0 %v4497_v0  ;;  %v2996_v0 = vld [vmem:[#allocation8] sm:$0x3] }
 0x203   :  { %3196 = vmatprep.subr.bf16.mxu0 %v4502_v7 }
 0x206   :  { %3197 = vmatpush2.bf16.msra.mxu0 %v4500_v10 }
 0x207   :  { %3198 = vmatprep.subr.bf16.mxu0 %v4505_v16  ;;  %v3832_v16 = vld [vmem:[#allocation11] ss:$0 sm:$0xff] }
 0x20a   :  { %3199 = vmatpush2.bf16.msra.mxu0 %v4503_v17 }
 0x20d   :  { %v2748_v2 = vpop.f32.mrf.mxu0 }
 0x20e   :  { %v2789_v3 = vpop.f32.mrf.mxu1  ;;  %v2749_v4 = vadd.f32 %v2748_v2, %v4836_v30  ;;  %v4516_v30 = vld [vmem:[#allocation10 + $0x50] sm:$0xff]   ;;  %v3001_v2 = vrot.slane %v2996_v0, %v540_v32 }
 0x20f   :  { %v2750_v5 = vpop.f32.mrf.mxu0  ;;  %3859 = vmatprep.subr.bf16.mxu1 %v4516_v30 }
 0x210   :  { %v2791_v6 = vpop.f32.mrf.mxu1  ;;  %v2790_v8 = vadd.f32 %v2789_v3, %v2749_v4  ;;  %v2751_v9 = vadd.f32 %v2750_v5, %v4839_v34  ;;  %3860 = vmatpush3.bf16.msra.mxu1 %v4517_v1  ;;  %v3005_v3 = vrot.slane %v2996_v0, %v544_v37 }
 0x211   :  { %v2752_v11 = vpop.f32.mrf.mxu0  ;;  %3861 = vmatprep.subr.bf16.mxu1 %v4518_v60 }
 0x212   :  { %v2793_v12 = vpop.f32.mrf.mxu1  ;;  %v2792_v13 = vadd.f32 %v2791_v6, %v2751_v9 }
 0x213   :  { %v2753_v14 = vpop.f32.mrf.mxu0 }
 0x214   :  { %v2794_v15 = vpop.f32.mrf.mxu1  ;;  %3862 = vmatpush3.bf16.msra.mxu1 %v4519_v61 }
 0x215   :  { %3863 = vmatprep.subr.bf16.mxu1 %v4520_v62 }
 0x218   :  { %3864 = vmatpush3.bf16.msra.mxu1 %v4521_v63 }
 0x24d   :  { %v2830_v31 = vpop.f32.mrf.mxu0 }
 0x24e   :  { %v2871_v33 = vpop.f32.mrf.mxu1  ;;  %v2831_v34 = vadd.f32 %v2830_v31, %v2790_v8 }
 0x24f   :  { %v2832_v35 = vpop.f32.mrf.mxu0 }
 0x250   :  { %v2873_v36 = vpop.f32.mrf.mxu1  ;;  %v2872_v38 = vadd.f32 %v2871_v33, %v2831_v34  ;;  %v2833_v42 = vadd.f32 %v2832_v35, %v2792_v13 }
 0x251   :  { %v2834_v39 = vpop.f32.mrf.mxu0 }
 0x252   :  { %v2875_v40 = vpop.f32.mrf.mxu1  ;;  %v2874_v44 = vadd.f32 %v2873_v36, %v2833_v42 }
 0x253   :  { %v2835_v41 = vpop.f32.mrf.mxu0 }
 0x254   :  { %v2876_v19 = vpop.f32.mrf.mxu1 }
 0x28d   :  { %v2912_v43 = vpop.f32.mrf.mxu0 }
 0x28e   :  { %v2953_v23 = vpop.f32.mrf.mxu1  ;;  %v2913_v45 = vadd.f32 %v2912_v43, %v2872_v38 }
 0x28f   :  { %v2914_v46 = vpop.f32.mrf.mxu0 }
 0x290   :  { %v2955_v47 = vpop.f32.mrf.mxu1  ;;  %v2954_v48 = vadd.f32 %v2953_v23, %v2913_v45  ;;  %v2915_v49 = vadd.f32 %v2914_v46, %v2874_v44 }
 0x291   :  { %v2916_v50 = vpop.f32.mrf.mxu0 }
 0x292   :  { %v2957_v51 = vpop.f32.mrf.mxu1  ;;  %v2956_v52 = vadd.f32 %v2955_v47, %v2915_v49  ;;  %v2960_v53 = vmax.f32 %v2954_v48, 0.0 }
 0x293   :  { %v2917_v54 = vpop.f32.mrf.mxu0 }
 0x294   :  { %v2958_v55 = vpop.f32.mrf.mxu1  ;;  %v2961_v56 = vmax.f32 %v2956_v52, 0.0  ;;  %v2962_v59 = vpack.c.bf16 %v2960_v53, %v2960_v53 }
 0x296   :  { %v2963_v57 = vpack.c.bf16 %v2961_v56, %v2961_v56 }
 0x298   :  { %3200 = vmatprep.mubr.bf16.mxu0 %v2963_v57 }
 0x299   :  { %3201 = vmatmul.mubr.bf16.vlgmr.msra.gmra.mxu0 %v2962_v59 }
 0x359   :  { %v3202_v4 = vpop.f32.mrf.mxu0 }
 0x35a   :  { %v3203_v5 = vadd.f32 %v3202_v4, %v3001_v2 }
 0x35b   :  { %v3204_v6 = vpop.f32.mrf.mxu0 }
 0x35c   :  { %v3205_v7 = vadd.f32 %v3204_v6, %v3005_v3  ;;  %v3209_v8 = vmax.f32 %v3203_v5, 0.0 }
 0x35d   :  { %v3206_v9 = vpop.f32.mrf.mxu0 }
 0x35e   :  { %v3210_v10 = vmax.f32 %v3205_v7, 0.0  ;;  %v3211_v13 = vpack.c.bf16 %v3209_v8, %v3209_v8 }
 0x35f   :  { %v3207_v11 = vpop.f32.mrf.mxu0 }
 0x360   :  { %v3212_v12 = vpack.c.bf16 %v3210_v10, %v3210_v10 }
 0x362   :  { %3380 = vmatprep.mubr.bf16.mxu1 %v3212_v12 }
 0x363   :  { %3381 = vmatmul.mubr.bf16.vlgmr.msra.gmra.mxu1 %v3211_v13 }
 0x423   :  { %v3865_v14 = vpop.f32.mrf.mxu1 }
 0x425   :  { %v3866_v15 = vpop.f32.mrf.mxu1 }
 0x426   :  { %v3867_v17 = vadd.f32 %v3866_v15, %v3865_v14 }
 0x427   :  { %v3868_v32 = vpop.f32.mrf.mxu1 }
 0x428   :  { %v3383_v18 = vadd.f32 %v3867_v17, %v3832_v16 }
 0x429   :  { %v3869_v25 = vpop.f32.mrf.mxu1 }
 0x42a   :  { %3388 = vmax.xlane.f32.xlu0 %v3383_v18 }
 0x4b3   :  { %v3389_v37 = vpop.xlane.xlu0 %3388 }
 0x4b4   :  { %v3390_v20 = vsub.f32 %v3383_v18, %v3389_v37 }
 0x4b6   :  { %v3391_v21 = vmul.f32 1.442695, %v3390_v20 }
 0x4b8   :  { %4522 = vpow2.f32 %v3391_v21 }
 0x4c5   :  { %v4523_v22 = vpop.eup %4522 }
 0x4c6   :  { %3393 = vadd.xlane.f32.xlu0 %v4523_v22 }
 0x54f   :  { %v3394_v58 = vpop.xlane.xlu0 %3393 }
 0x550   :  { %4524 = vrcp.f32 %v3394_v58 }
 0x55d   :  { %v4525_v24 = vpop.eup %4524 }
 0x55e   :  { %v3396_v26 = vmul.f32 %v4525_v24, %v4523_v22 }
 0x560   :  { %3397 = vst [vmem:[#allocation13] sm:$0xff] %v3396_v26 }
 0x561   :  { %4657 = shalt.err (!%p4654_p6)
}
 0x562   :  { %3407 = dma.vmem_to_hbm [thread:$0]  %s3405_s1, 128, %s4857_s7, [#allocation4]  }
 0x563   :  { %4674 = dma.done.wait [#allocation4], 128  }
 0x564   :  { %4675 = vsyncadd [#allocation4], 4294967168 }
 0x565   :  { %3411 = vsyncpa [#allocation3], 1 }
 0x566   :  { %3412 = vsyncpa [#allocation6], 1 }
 0x567   :  { %3413 = vsyncpa [#allocation9], 1 }
 0x568   :  { %3414 = vsyncpa [#allocation12], 1 }
 0x569   :  { %3415 = vsyncpa [#allocation4], 1 }

</bundles_post_ra>
